<compile_context>
chip_gen: v7x
topology: tpu7x:2x2x1
jax: 0.10.0
libtpu: 0.0.40
codegen_flags: <defaults>
</compile_context>

<pallas_src>
from collections import OrderedDict
from functools import partial

import jax
import jax.numpy as jnp
from jax.experimental import pallas as pl
from jax.experimental.pallas import tpu as pltpu

LANES = 128
SUBLANES = 8
VMEM_LIMIT_BYTES = 32 * 1024 * 1024   # safe on v7x (64 MiB physical VMEM)


def _round_up(x, m):
    return (x + m - 1) // m * m


# ----------------------------------------------------------------------------
# Pallas kernel: grouped conv-as-matmul
# ----------------------------------------------------------------------------
def _group_conv_kernel(widx_ref, p_ref, w_ref, b_ref, o_ref, *, relu):
    """One fused MXU matmul per M-tile: [tm, Kc] @ [Kc, Cout_p] + bias (+ReLU).

    widx_ref : SMEM int32[n_tiles]   per-tile weight index (used by index_maps)
    p_ref    : VMEM bf16[tm, Kc]     im2col rows of the current tile
    w_ref    : VMEM bf16[Kc, Cout_p] this tile's level weights (lane-dense)
    b_ref    : VMEM f32 [1, Cout_p]  this tile's level bias
    o_ref    : VMEM    [tm, Cout_p]  lane-dense output tile (f32 or bf16)
    """
    del widx_ref  # consumed by the BlockSpec index_maps only
    acc = jnp.dot(p_ref[...], w_ref[...], preferred_element_type=jnp.float32)
    acc = acc + b_ref[...]
    if relu:
        acc = jnp.maximum(acc, 0.0)
    o_ref[...] = acc.astype(o_ref.dtype)


# ----------------------------------------------------------------------------
# Glue: im2col (pure slicing / reshape, no compute)
# ----------------------------------------------------------------------------
def _im2col(x, KH, KW, stride, padding):
    N, H, W, Cin = x.shape
    Ho = (H + 2 * padding - KH) // stride + 1
    Wo = (W + 2 * padding - KW) // stride + 1
    M = N * Ho * Wo
    if KH == 1 and KW == 1 and stride == 1 and padding == 0:
        return x.reshape(M, Cin), (N, Ho, Wo)
    xp = jnp.pad(x, ((0, 0), (padding, padding), (padding, padding), (0, 0)))
    taps = []
    for kh in range(KH):
        for kw in range(KW):
            sl = xp[:, kh:kh + stride * (Ho - 1) + 1:stride,
                    kw:kw + stride * (Wo - 1) + 1:stride, :]
            taps.append(sl.reshape(M, Cin))
    return jnp.concatenate(taps, axis=1), (N, Ho, Wo)


# ----------------------------------------------------------------------------
# Grouped conv wrapper: several convs with identical (KH, KW, Cout) in ONE call
# ----------------------------------------------------------------------------
def conv2d_group_pallas(xs, ws, bs, *, stride=1, padding=0, relu=False,
                        out_dtype=jnp.float32, tile_m=128):
    """xs: list of NHWC inputs, ws: list of HWIO weights (same KH,KW,Cout),
    bs: list of [Cout] biases.  Returns list of NHWC outputs (one per level)."""
    L = len(xs)
    KH, KW, _, Cout = ws[0].shape
    Cout_p = _round_up(Cout, LANES)

    cols, out_shapes, Ks = [], [], []
    for x, w in zip(xs, ws):
        p, sh = _im2col(x, KH, KW, stride, padding)
        cols.append(p)
        out_shapes.append(sh)
        Ks.append(p.shape[1])
    # Common contraction width, padded to a multiple of 16 for bf16 sublane packing.
    Kc = _round_up(max(Ks), 16)

    max_M = max(p.shape[0] for p in cols)
    tm = max(SUBLANES, min(tile_m, _round_up(max_M, SUBLANES)))  # multiple of 8

    # Pad each level's rows to a multiple of tm, concatenate along M.
    p_blocks, widx_list, level_rows, Ms = [], [], [], []
    for lvl, p in enumerate(cols):
        M, K = p.shape
        Mp = _round_up(M, tm)
        p = jnp.pad(p.astype(jnp.bfloat16), ((0, Mp - M), (0, Kc - K)))
        p_blocks.append(p)
        Ms.append(M)
        level_rows.append(Mp)
        widx_list.extend([lvl] * (Mp // tm))
    P = jnp.concatenate(p_blocks, axis=0) if L > 1 else p_blocks[0]   # [Mt, Kc] bf16
    Mt = P.shape[0]
    n_tiles = Mt // tm
    widx = jnp.asarray(widx_list, dtype=jnp.int32)                    # per-tile level id

    # Stacked lane-dense weights / biases, zero-padded so padded K columns and
    # padded Cout lanes contribute exactly zero.
    Wst = jnp.stack([
        jnp.pad(w.reshape(-1, Cout).astype(jnp.bfloat16),
                ((0, Kc - w.reshape(-1, Cout).shape[0]), (0, Cout_p - Cout)))
        for w in ws])                                                 # [L, Kc, Cout_p]
    Bst = jnp.stack([
        jnp.pad(b.reshape(1, Cout).astype(jnp.float32),
                ((0, 0), (0, Cout_p - Cout)))
        for b in bs])                                                 # [L, 1, Cout_p]

    out_bytes = jnp.dtype(out_dtype).itemsize
    cost = pl.CostEstimate(                                           # real (unpadded) work
        flops=int(2 * sum(m * k * Cout for m, k in zip(Ms, Ks))),
        transcendentals=0,
        bytes_accessed=int(sum(m * k for m, k in zip(Ms, Ks)) * 2
                           + L * Kc * Cout_p * 2 + L * Cout_p * 4
                           + sum(Ms) * Cout * out_bytes))

    grid_spec = pltpu.PrefetchScalarGridSpec(
        num_scalar_prefetch=1,
        grid=(n_tiles,),
        in_specs=[
            pl.BlockSpec((tm, Kc), lambda i, widx: (i, 0)),                 # im2col rows
            pl.BlockSpec((None, Kc, Cout_p), lambda i, widx: (widx[i], 0, 0)),  # per-level W
            pl.BlockSpec((None, 1, Cout_p), lambda i, widx: (widx[i], 0, 0)),   # per-level b
        ],
        out_specs=pl.BlockSpec((tm, Cout_p), lambda i, widx: (i, 0)),
    )

    out = pl.pallas_call(
        partial(_group_conv_kernel, relu=relu),
        out_shape=jax.ShapeDtypeStruct((Mt, Cout_p), out_dtype),
        grid_spec=grid_spec,
        compiler_params=pltpu.CompilerParams(
            dimension_semantics=("parallel",),
            vmem_limit_bytes=VMEM_LIMIT_BYTES),
        cost_estimate=cost,
    )(widx, P, Wst, Bst)

    outs, off = [], 0
    for lvl in range(L):
        N, Ho, Wo = out_shapes[lvl]
        outs.append(out[off:off + Ms[lvl], :Cout].reshape(N, Ho, Wo, Cout))
        off += level_rows[lvl]
    return outs


def conv2d_pallas(x, w, b, *, stride=1, padding=0, relu=False,
                  out_dtype=jnp.float32, tile_m=256):
    return conv2d_group_pallas([x], [w], [b], stride=stride, padding=padding,
                               relu=relu, out_dtype=out_dtype, tile_m=tile_m)[0]


# ----------------------------------------------------------------------------
# Model definition (deterministic synthetic parameters)
# ----------------------------------------------------------------------------
IN_CHANNELS_LIST = (4, 8, 16, 32)      # channels of backbone features '0'..'3'
OUT_CHANNELS = 8                       # FPN out_channels
CONV_CHANNELS = IN_CHANNELS_LIST[-1]   # conv3 acts on x['3']


def init_params(key, in_ch=3):
    def conv_p(k, kh, kw, cin, cout):
        kw_, kb_ = jax.random.split(k)
        return {
            "w": 0.1 * jax.random.normal(kw_, (kh, kw, cin, cout), jnp.float32),
            "b": 0.01 * jax.random.normal(kb_, (cout,), jnp.float32),
        }

    keys = jax.random.split(key, 13)
    params = {"body": [], "inner": [], "layer": []}
    cin = in_ch
    for i, cout in enumerate(IN_CHANNELS_LIST):             # synthetic backbone stages
        params["body"].append(conv_p(keys[i], 3, 3, cin, cout))
        cin = cout
    for i, c in enumerate(IN_CHANNELS_LIST):                # FPN lateral (1x1) + output (3x3)
        params["inner"].append(conv_p(keys[4 + i], 1, 1, c, OUT_CHANNELS))
        params["layer"].append(conv_p(keys[8 + i], 3, 3, OUT_CHANNELS, OUT_CHANNELS))
    c3 = conv_p(keys[12], 3, 3, CONV_CHANNELS, CONV_CHANNELS)  # self.conv3
    params["conv3_w"], params["conv3_b"] = c3["w"], c3["b"]
    return params


def backbone_with_fpn_forward(x_nchw, params):
    """Mirror of BackboneWithFPN.forward: (OrderedDict of FPN maps, featuremap)."""
    x = jnp.transpose(x_nchw, (0, 2, 3, 1))   # NCHW -> NHWC

    # ---- body: IntermediateLayerGetter over a synthetic 4-stage backbone ----
    # Sequential dependency -> 4 launches; intermediates stored bf16.
    feats = OrderedDict()
    h = x
    for i in range(4):
        h = conv2d_pallas(h, params["body"][i]["w"], params["body"][i]["b"],
                          stride=2, padding=1, relu=True,
                          out_dtype=jnp.bfloat16, tile_m=256)
        feats[str(i)] = h

    # ---- featuremap = self.conv3(x['3']) (returned -> f32) ----
    featuremap = conv2d_pallas(feats["3"], params["conv3_w"], params["conv3_b"],
                               stride=1, padding=1, relu=False,
                               out_dtype=jnp.float32, tile_m=256)

    # ---- FPN lateral 1x1 convs: all 4 levels in ONE pallas_call ----
    inner = conv2d_group_pallas(
        [feats[str(i)] for i in range(4)],
        [params["inner"][i]["w"] for i in range(4)],
        [params["inner"][i]["b"] for i in range(4)],
        stride=1, padding=0, relu=False, out_dtype=jnp.bfloat16, tile_m=128)

    # ---- top-down merge: nearest-2x upsample + add (tiny elementwise glue) ----
    # TODO(synk): fold the nearest-2x replication into the next conv's residual
    # BlockSpec index_map instead of materializing `up`.
    last_inner = [None] * 4
    last_inner[3] = inner[3]
    for idx in range(2, -1, -1):
        rh = inner[idx].shape[1] // last_inner[idx + 1].shape[1]
        rw = inner[idx].shape[2] // last_inner[idx + 1].shape[2]
        up = jnp.repeat(jnp.repeat(last_inner[idx + 1], rh, axis=1), rw, axis=2)
        last_inner[idx] = inner[idx] + up

    # ---- FPN 3x3 output convs: all 4 levels in ONE pallas_call (f32, returned) ----
    results = conv2d_group_pallas(
        last_inner,
        [params["layer"][i]["w"] for i in range(4)],
        [params["layer"][i]["b"] for i in range(4)],
        stride=1, padding=1, relu=False, out_dtype=jnp.float32, tile_m=128)

    # LastLevelMaxPool: max_pool2d(kernel=1, stride=2, pad=0) == strided subsampling.
    pool = results[3][:, ::2, ::2, :]

    fpn_out = OrderedDict()
    for i in range(4):
        fpn_out[str(i)] = jnp.transpose(results[i], (0, 3, 1, 2))  # back to NCHW
    fpn_out["pool"] = jnp.transpose(pool, (0, 3, 1, 2))
    featuremap = jnp.transpose(featuremap, (0, 3, 1, 2))
    return fpn_out, featuremap


# ----------------------------------------------------------------------------
if __name__ == "__main__":
    key = jax.random.PRNGKey(0)
    k_x, k_p = jax.random.split(key)
    x = jax.random.normal(k_x, (2, 3, 32, 32), jnp.float32)   # NCHW, like PyTorch
    params = init_params(k_p, in_ch=3)

    fwd = jax.jit(backbone_with_fpn_forward)
    fpn_out, featuremap = fwd(x, params)
    jax.block_until_ready(featuremap)
    for v in fpn_out.values():
        jax.block_until_ready(v)

    # sanity checks on shapes implied by the module
    assert featuremap.shape == (2, CONV_CHANNELS, 2, 2)
    assert fpn_out["0"].shape == (2, OUT_CHANNELS, 16, 16)
    assert fpn_out["1"].shape == (2, OUT_CHANNELS, 8, 8)
    assert fpn_out["2"].shape == (2, OUT_CHANNELS, 4, 4)
    assert fpn_out["3"].shape == (2, OUT_CHANNELS, 2, 2)
    assert fpn_out["pool"].shape == (2, OUT_CHANNELS, 1, 1)
    print("KERNEL_OK")
</pallas_src>

<mosaic_0001>
module attributes {stable_mosaic.version = 11 : i64} {
  func.func @_group_conv_kernel(%arg0: i32, %arg1: memref<2xi32, #tpu.memory_space<smem>>, %arg2: memref<256x32xbf16, #tpu.memory_space<vmem>>, %arg3: memref<1x32x128xbf16, #tpu.memory_space<vmem>>, %arg4: memref<1x1x128xf32, #tpu.memory_space<vmem>>, %arg5: memref<256x128xbf16, #tpu.memory_space<vmem>>) attributes {dimension_semantics = [#tpu.dimension_semantics<parallel>], iteration_bounds = array<i64: 2>, scalar_prefetch = 1 : i64, scratch_operands = 0 : i64, tpu.core_type = #tpu.core_type<tc>, window_params = [{transform_indices = @transform_0, window_bounds = array<i64: 256, 32>}, {transform_indices = @transform_1, window_bounds = array<i64: 1, 32, 128>}, {transform_indices = @transform_2, window_bounds = array<i64: 1, 1, 128>}, {transform_indices = @transform_3, window_bounds = array<i64: 256, 128>}]} {
    %c0 = arith.constant 0 : index
    %c0_0 = arith.constant 0 : index
    %0 = vector.load %arg2[%c0, %c0_0] : memref<256x32xbf16, #tpu.memory_space<vmem>>, vector<256x32xbf16>
    %c0_1 = arith.constant 0 : index
    %c0_2 = arith.constant 0 : index
    %c0_3 = arith.constant 0 : index
    %1 = vector.load %arg3[%c0_1, %c0_2, %c0_3] : memref<1x32x128xbf16, #tpu.memory_space<vmem>>, vector<1x32x128xbf16>
    %2 = vector.shape_cast %1 : vector<1x32x128xbf16> to vector<32x128xbf16>
    %cst = arith.constant dense<0.000000e+00> : vector<256x128xf32>
    %3 = tpu.matmul %0, %2, %cst {dimension_numbers = #tpu.dot_dimension_numbers<[1], [0], [0], [1], [0, 0, 1, 1], [], []>} : vector<256x32xbf16>, vector<32x128xbf16>, vector<256x128xf32> -> vector<256x128xf32>
    %c0_4 = arith.constant 0 : index
    %c0_5 = arith.constant 0 : index
    %c0_6 = arith.constant 0 : index
    %4 = vector.load %arg4[%c0_4, %c0_5, %c0_6] : memref<1x1x128xf32, #tpu.memory_space<vmem>>, vector<1x1x128xf32>
    %5 = vector.shape_cast %4 : vector<1x1x128xf32> to vector<1x128xf32>
    %6 = vector.broadcast %5 : vector<1x128xf32> to vector<256x128xf32>
    %7 = arith.addf %3, %6 : vector<256x128xf32>
    %cst_7 = arith.constant 0.000000e+00 : f32
    %8 = vector.broadcast %cst_7 : f32 to vector<256x128xf32>
    %9 = arith.maximumf %7, %8 : vector<256x128xf32>
    %10 = arith.truncf %9 : vector<256x128xf32> to vector<256x128xbf16>
    %c0_8 = arith.constant 0 : index
    %c0_9 = arith.constant 0 : index
    %11 = vector.load %arg5[%c0_8, %c0_9] : memref<256x128xbf16, #tpu.memory_space<vmem>>, vector<256x128xbf16>
    tpu.vector_store %arg5[%c0_8, %c0_9], %10 {strides = array<i32>} : memref<256x128xbf16, #tpu.memory_space<vmem>>, vector<256x128xbf16>,
    return
  }
  func.func @transform_0(%arg0: i32, %arg1: memref<2xi32, #tpu.memory_space<smem>>) -> (i32, i32) {
    %c0_i32 = arith.constant 0 : i32
    %c0_i32_0 = arith.constant 0 : i32
    return %arg0, %c0_i32 : i32, i32
  }
  func.func @transform_1(%arg0: i32, %arg1: memref<2xi32, #tpu.memory_space<smem>>) -> (i32, i32, i32) {
    %0 = arith.index_cast %arg0 : i32 to index
    %1 = memref.load %arg1[%0] : memref<2xi32, #tpu.memory_space<smem>>
    %c0_i32 = arith.constant 0 : i32
    %c0_i32_0 = arith.constant 0 : i32
    %c0_i32_1 = arith.constant 0 : i32
    return %1, %c0_i32, %c0_i32_0 : i32, i32, i32
  }
  func.func @transform_2(%arg0: i32, %arg1: memref<2xi32, #tpu.memory_space<smem>>) -> (i32, i32, i32) {
    %0 = arith.index_cast %arg0 : i32 to index
    %1 = memref.load %arg1[%0] : memref<2xi32, #tpu.memory_space<smem>>
    %c0_i32 = arith.constant 0 : i32
    %c0_i32_0 = arith.constant 0 : i32
    %c0_i32_1 = arith.constant 0 : i32
    return %1, %c0_i32, %c0_i32_0 : i32, i32, i32
  }
  func.func @transform_3(%arg0: i32, %arg1: memref<2xi32, #tpu.memory_space<smem>>) -> (i32, i32) {
    %c0_i32 = arith.constant 0 : i32
    %c0_i32_0 = arith.constant 0 : i32
    return %arg0, %c0_i32 : i32, i32
  }
}

module attributes {stable_mosaic.version = 11 : i64} {
  func.func @_group_conv_kernel(%arg0: i32, %arg1: memref<1xi32, #tpu.memory_space<smem>>, %arg2: memref<128x48xbf16, #tpu.memory_space<vmem>>, %arg3: memref<1x48x128xbf16, #tpu.memory_space<vmem>>, %arg4: memref<1x1x128xf32, #tpu.memory_space<vmem>>, %arg5: memref<128x128xbf16, #tpu.memory_space<vmem>>) attributes {dimension_semantics = [#tpu.dimension_semantics<parallel>], iteration_bounds = array<i64: 1>, scalar_prefetch = 1 : i64, scratch_operands = 0 : i64, tpu.core_type = #tpu.core_type<tc>, window_params = [{transform_indices = @transform_0, window_bounds = array<i64: 128, 48>}, {transform_indices = @transform_1, window_bounds = array<i64: 1, 48, 128>}, {transform_indices = @transform_2, window_bounds = array<i64: 1, 1, 128>}, {transform_indices = @transform_3, window_bounds = array<i64: 128, 128>}]} {
    %c0 = arith.constant 0 : index
    %c0_0 = arith.constant 0 : index
    %0 = vector.load %arg2[%c0, %c0_0] : memref<128x48xbf16, #tpu.memory_space<vmem>>, vector<128x48xbf16>
    %c0_1 = arith.constant 0 : index
    %c0_2 = arith.constant 0 : index
    %c0_3 = arith.constant 0 : index
    %1 = vector.load %arg3[%c0_1, %c0_2, %c0_3] : memref<1x48x128xbf16, #tpu.memory_space<vmem>>, vector<1x48x128xbf16>
    %2 = vector.shape_cast %1 : vector<1x48x128xbf16> to vector<48x128xbf16>
    %cst = arith.constant dense<0.000000e+00> : vector<128x128xf32>
    %3 = tpu.matmul %0, %2, %cst {dimension_numbers = #tpu.dot_dimension_numbers<[1], [0], [0], [1], [0, 0, 1, 1], [], []>} : vector<128x48xbf16>, vector<48x128xbf16>, vector<128x128xf32> -> vector<128x128xf32>
    %c0_4 = arith.constant 0 : index
    %c0_5 = arith.constant 0 : index
    %c0_6 = arith.constant 0 : index
    %4 = vector.load %arg4[%c0_4, %c0_5, %c0_6] : memref<1x1x128xf32, #tpu.memory_space<vmem>>, vector<1x1x128xf32>
    %5 = vector.shape_cast %4 : vector<1x1x128xf32> to vector<1x128xf32>
    %6 = vector.broadcast %5 : vector<1x128xf32> to vector<128x128xf32>
    %7 = arith.addf %3, %6 : vector<128x128xf32>
    %cst_7 = arith.constant 0.000000e+00 : f32
    %8 = vector.broadcast %cst_7 : f32 to vector<128x128xf32>
    %9 = arith.maximumf %7, %8 : vector<128x128xf32>
    %10 = arith.truncf %9 : vector<128x128xf32> to vector<128x128xbf16>
    %c0_8 = arith.constant 0 : index
    %c0_9 = arith.constant 0 : index
    %11 = vector.load %arg5[%c0_8, %c0_9] : memref<128x128xbf16, #tpu.memory_space<vmem>>, vector<128x128xbf16>
    tpu.vector_store %arg5[%c0_8, %c0_9], %10 {strides = array<i32>} : memref<128x128xbf16, #tpu.memory_space<vmem>>, vector<128x128xbf16>,
    return
  }
  func.func @transform_0(%arg0: i32, %arg1: memref<1xi32, #tpu.memory_space<smem>>) -> (i32, i32) {
    %c0_i32 = arith.constant 0 : i32
    %c0_i32_0 = arith.constant 0 : i32
    return %arg0, %c0_i32 : i32, i32
  }
  func.func @transform_1(%arg0: i32, %arg1: memref<1xi32, #tpu.memory_space<smem>>) -> (i32, i32, i32) {
    %0 = arith.index_cast %arg0 : i32 to index
    %1 = memref.load %arg1[%0] : memref<1xi32, #tpu.memory_space<smem>>
    %c0_i32 = arith.constant 0 : i32
    %c0_i32_0 = arith.constant 0 : i32
    %c0_i32_1 = arith.constant 0 : i32
    return %1, %c0_i32, %c0_i32_0 : i32, i32, i32
  }
  func.func @transform_2(%arg0: i32, %arg1: memref<1xi32, #tpu.memory_space<smem>>) -> (i32, i32, i32) {
    %0 = arith.index_cast %arg0 : i32 to index
    %1 = memref.load %arg1[%0] : memref<1xi32, #tpu.memory_space<smem>>
    %c0_i32 = arith.constant 0 : i32
    %c0_i32_0 = arith.constant 0 : i32
    %c0_i32_1 = arith.constant 0 : i32
    return %1, %c0_i32, %c0_i32_0 : i32, i32, i32
  }
  func.func @transform_3(%arg0: i32, %arg1: memref<1xi32, #tpu.memory_space<smem>>) -> (i32, i32) {
    %c0_i32 = arith.constant 0 : i32
    %c0_i32_0 = arith.constant 0 : i32
    return %arg0, %c0_i32 : i32, i32
  }
}

module attributes {stable_mosaic.version = 11 : i64} {
  func.func @_group_conv_kernel(%arg0: i32, %arg1: memref<1xi32, #tpu.memory_space<smem>>, %arg2: memref<32x80xbf16, #tpu.memory_space<vmem>>, %arg3: memref<1x80x128xbf16, #tpu.memory_space<vmem>>, %arg4: memref<1x1x128xf32, #tpu.memory_space<vmem>>, %arg5: memref<32x128xbf16, #tpu.memory_space<vmem>>) attributes {dimension_semantics = [#tpu.dimension_semantics<parallel>], iteration_bounds = array<i64: 1>, scalar_prefetch = 1 : i64, scratch_operands = 0 : i64, tpu.core_type = #tpu.core_type<tc>, window_params = [{transform_indices = @transform_0, window_bounds = array<i64: 32, 80>}, {transform_indices = @transform_1, window_bounds = array<i64: 1, 80, 128>}, {transform_indices = @transform_2, window_bounds = array<i64: 1, 1, 128>}, {transform_indices = @transform_3, window_bounds = array<i64: 32, 128>}]} {
    %c0 = arith.constant 0 : index
    %c0_0 = arith.constant 0 : index
    %0 = vector.load %arg2[%c0, %c0_0] : memref<32x80xbf16, #tpu.memory_space<vmem>>, vector<32x80xbf16>
    %c0_1 = arith.constant 0 : index
    %c0_2 = arith.constant 0 : index
    %c0_3 = arith.constant 0 : index
    %1 = vector.load %arg3[%c0_1, %c0_2, %c0_3] : memref<1x80x128xbf16, #tpu.memory_space<vmem>>, vector<1x80x128xbf16>
    %2 = vector.shape_cast %1 : vector<1x80x128xbf16> to vector<80x128xbf16>
    %cst = arith.constant dense<0.000000e+00> : vector<32x128xf32>
    %3 = tpu.matmul %0, %2, %cst {dimension_numbers = #tpu.dot_dimension_numbers<[1], [0], [0], [1], [0, 0, 1, 1], [], []>} : vector<32x80xbf16>, vector<80x128xbf16>, vector<32x128xf32> -> vector<32x128xf32>
    %c0_4 = arith.constant 0 : index
    %c0_5 = arith.constant 0 : index
    %c0_6 = arith.constant 0 : index
    %4 = vector.load %arg4[%c0_4, %c0_5, %c0_6] : memref<1x1x128xf32, #tpu.memory_space<vmem>>, vector<1x1x128xf32>
    %5 = vector.shape_cast %4 : vector<1x1x128xf32> to vector<1x128xf32>
    %6 = vector.broadcast %5 : vector<1x128xf32> to vector<32x128xf32>
    %7 = arith.addf %3, %6 : vector<32x128xf32>
    %cst_7 = arith.constant 0.000000e+00 : f32
    %8 = vector.broadcast %cst_7 : f32 to vector<32x128xf32>
    %9 = arith.maximumf %7, %8 : vector<32x128xf32>
    %10 = arith.truncf %9 : vector<32x128xf32> to vector<32x128xbf16>
    %c0_8 = arith.constant 0 : index
    %c0_9 = arith.constant 0 : index
    %11 = vector.load %arg5[%c0_8, %c0_9] : memref<32x128xbf16, #tpu.memory_space<vmem>>, vector<32x128xbf16>
    tpu.vector_store %arg5[%c0_8, %c0_9], %10 {strides = array<i32>} : memref<32x128xbf16, #tpu.memory_space<vmem>>, vector<32x128xbf16>,
    return
  }
  func.func @transform_0(%arg0: i32, %arg1: memref<1xi32, #tpu.memory_space<smem>>) -> (i32, i32) {
    %c0_i32 = arith.constant 0 : i32
    %c0_i32_0 = arith.constant 0 : i32
    return %arg0, %c0_i32 : i32, i32
  }
  func.func @transform_1(%arg0: i32, %arg1: memref<1xi32, #tpu.memory_space<smem>>) -> (i32, i32, i32) {
    %0 = arith.index_cast %arg0 : i32 to index
    %1 = memref.load %arg1[%0] : memref<1xi32, #tpu.memory_space<smem>>
    %c0_i32 = arith.constant 0 : i32
    %c0_i32_0 = arith.constant 0 : i32
    %c0_i32_1 = arith.constant 0 : i32
    return %1, %c0_i32, %c0_i32_0 : i32, i32, i32
  }
  func.func @transform_2(%arg0: i32, %arg1: memref<1xi32, #tpu.memory_space<smem>>) -> (i32, i32, i32) {
    %0 = arith.index_cast %arg0 : i32 to index
    %1 = memref.load %arg1[%0] : memref<1xi32, #tpu.memory_space<smem>>
    %c0_i32 = arith.constant 0 : i32
    %c0_i32_0 = arith.constant 0 : i32
    %c0_i32_1 = arith.constant 0 : i32
    return %1, %c0_i32, %c0_i32_0 : i32, i32, i32
  }
  func.func @transform_3(%arg0: i32, %arg1: memref<1xi32, #tpu.memory_space<smem>>) -> (i32, i32) {
    %c0_i32 = arith.constant 0 : i32
    %c0_i32_0 = arith.constant 0 : i32
    return %arg0, %c0_i32 : i32, i32
  }
}

module attributes {stable_mosaic.version = 11 : i64} {
  func.func @_group_conv_kernel(%arg0: i32, %arg1: memref<1xi32, #tpu.memory_space<smem>>, %arg2: memref<8x144xbf16, #tpu.memory_space<vmem>>, %arg3: memref<1x144x128xbf16, #tpu.memory_space<vmem>>, %arg4: memref<1x1x128xf32, #tpu.memory_space<vmem>>, %arg5: memref<8x128xbf16, #tpu.memory_space<vmem>>) attributes {dimension_semantics = [#tpu.dimension_semantics<parallel>], iteration_bounds = array<i64: 1>, scalar_prefetch = 1 : i64, scratch_operands = 0 : i64, tpu.core_type = #tpu.core_type<tc>, window_params = [{transform_indices = @transform_0, window_bounds = array<i64: 8, 144>}, {transform_indices = @transform_1, window_bounds = array<i64: 1, 144, 128>}, {transform_indices = @transform_2, window_bounds = array<i64: 1, 1, 128>}, {transform_indices = @transform_3, window_bounds = array<i64: 8, 128>}]} {
    %c0 = arith.constant 0 : index
    %c0_0 = arith.constant 0 : index
    %0 = vector.load %arg2[%c0, %c0_0] : memref<8x144xbf16, #tpu.memory_space<vmem>>, vector<8x144xbf16>
    %c0_1 = arith.constant 0 : index
    %c0_2 = arith.constant 0 : index
    %c0_3 = arith.constant 0 : index
    %1 = vector.load %arg3[%c0_1, %c0_2, %c0_3] : memref<1x144x128xbf16, #tpu.memory_space<vmem>>, vector<1x144x128xbf16>
    %2 = vector.shape_cast %1 : vector<1x144x128xbf16> to vector<144x128xbf16>
    %cst = arith.constant dense<0.000000e+00> : vector<8x128xf32>
    %3 = tpu.matmul %0, %2, %cst {dimension_numbers = #tpu.dot_dimension_numbers<[1], [0], [0], [1], [0, 0, 1, 1], [], []>} : vector<8x144xbf16>, vector<144x128xbf16>, vector<8x128xf32> -> vector<8x128xf32>
    %c0_4 = arith.constant 0 : index
    %c0_5 = arith.constant 0 : index
    %c0_6 = arith.constant 0 : index
    %4 = vector.load %arg4[%c0_4, %c0_5, %c0_6] : memref<1x1x128xf32, #tpu.memory_space<vmem>>, vector<1x1x128xf32>
    %5 = vector.shape_cast %4 : vector<1x1x128xf32> to vector<1x128xf32>
    %6 = vector.broadcast %5 : vector<1x128xf32> to vector<8x128xf32>
    %7 = arith.addf %3, %6 : vector<8x128xf32>
    %cst_7 = arith.constant 0.000000e+00 : f32
    %8 = vector.broadcast %cst_7 : f32 to vector<8x128xf32>
    %9 = arith.maximumf %7, %8 : vector<8x128xf32>
    %10 = arith.truncf %9 : vector<8x128xf32> to vector<8x128xbf16>
    %c0_8 = arith.constant 0 : index
    %c0_9 = arith.constant 0 : index
    %11 = vector.load %arg5[%c0_8, %c0_9] : memref<8x128xbf16, #tpu.memory_space<vmem>>, vector<8x128xbf16>
    tpu.vector_store %arg5[%c0_8, %c0_9], %10 {strides = array<i32>} : memref<8x128xbf16, #tpu.memory_space<vmem>>, vector<8x128xbf16>,
    return
  }
  func.func @transform_0(%arg0: i32, %arg1: memref<1xi32, #tpu.memory_space<smem>>) -> (i32, i32) {
    %c0_i32 = arith.constant 0 : i32
    %c0_i32_0 = arith.constant 0 : i32
    return %arg0, %c0_i32 : i32, i32
  }
  func.func @transform_1(%arg0: i32, %arg1: memref<1xi32, #tpu.memory_space<smem>>) -> (i32, i32, i32) {
    %0 = arith.index_cast %arg0 : i32 to index
    %1 = memref.load %arg1[%0] : memref<1xi32, #tpu.memory_space<smem>>
    %c0_i32 = arith.constant 0 : i32
    %c0_i32_0 = arith.constant 0 : i32
    %c0_i32_1 = arith.constant 0 : i32
    return %1, %c0_i32, %c0_i32_0 : i32, i32, i32
  }
  func.func @transform_2(%arg0: i32, %arg1: memref<1xi32, #tpu.memory_space<smem>>) -> (i32, i32, i32) {
    %0 = arith.index_cast %arg0 : i32 to index
    %1 = memref.load %arg1[%0] : memref<1xi32, #tpu.memory_space<smem>>
    %c0_i32 = arith.constant 0 : i32
    %c0_i32_0 = arith.constant 0 : i32
    %c0_i32_1 = arith.constant 0 : i32
    return %1, %c0_i32, %c0_i32_0 : i32, i32, i32
  }
  func.func @transform_3(%arg0: i32, %arg1: memref<1xi32, #tpu.memory_space<smem>>) -> (i32, i32) {
    %c0_i32 = arith.constant 0 : i32
    %c0_i32_0 = arith.constant 0 : i32
    return %arg0, %c0_i32 : i32, i32
  }
}

module attributes {stable_mosaic.version = 11 : i64} {
  func.func @_group_conv_kernel(%arg0: i32, %arg1: memref<7xi32, #tpu.memory_space<smem>>, %arg2: memref<128x32xbf16, #tpu.memory_space<vmem>>, %arg3: memref<1x32x128xbf16, #tpu.memory_space<vmem>>, %arg4: memref<1x1x128xf32, #tpu.memory_space<vmem>>, %arg5: memref<128x128xbf16, #tpu.memory_space<vmem>>) attributes {dimension_semantics = [#tpu.dimension_semantics<parallel>], iteration_bounds = array<i64: 7>, scalar_prefetch = 1 : i64, scratch_operands = 0 : i64, tpu.core_type = #tpu.core_type<tc>, window_params = [{transform_indices = @transform_0, window_bounds = array<i64: 128, 32>}, {transform_indices = @transform_1, window_bounds = array<i64: 1, 32, 128>}, {transform_indices = @transform_2, window_bounds = array<i64: 1, 1, 128>}, {transform_indices = @transform_3, window_bounds = array<i64: 128, 128>}]} {
    %c0 = arith.constant 0 : index
    %c0_0 = arith.constant 0 : index
    %0 = vector.load %arg2[%c0, %c0_0] : memref<128x32xbf16, #tpu.memory_space<vmem>>, vector<128x32xbf16>
    %c0_1 = arith.constant 0 : index
    %c0_2 = arith.constant 0 : index
    %c0_3 = arith.constant 0 : index
    %1 = vector.load %arg3[%c0_1, %c0_2, %c0_3] : memref<1x32x128xbf16, #tpu.memory_space<vmem>>, vector<1x32x128xbf16>
    %2 = vector.shape_cast %1 : vector<1x32x128xbf16> to vector<32x128xbf16>
    %cst = arith.constant dense<0.000000e+00> : vector<128x128xf32>
    %3 = tpu.matmul %0, %2, %cst {dimension_numbers = #tpu.dot_dimension_numbers<[1], [0], [0], [1], [0, 0, 1, 1], [], []>} : vector<128x32xbf16>, vector<32x128xbf16>, vector<128x128xf32> -> vector<128x128xf32>
    %c0_4 = arith.constant 0 : index
    %c0_5 = arith.constant 0 : index
    %c0_6 = arith.constant 0 : index
    %4 = vector.load %arg4[%c0_4, %c0_5, %c0_6] : memref<1x1x128xf32, #tpu.memory_space<vmem>>, vector<1x1x128xf32>
    %5 = vector.shape_cast %4 : vector<1x1x128xf32> to vector<1x128xf32>
    %6 = vector.broadcast %5 : vector<1x128xf32> to vector<128x128xf32>
    %7 = arith.addf %3, %6 : vector<128x128xf32>
    %8 = arith.truncf %7 : vector<128x128xf32> to vector<128x128xbf16>
    %c0_7 = arith.constant 0 : index
    %c0_8 = arith.constant 0 : index
    %9 = vector.load %arg5[%c0_7, %c0_8] : memref<128x128xbf16, #tpu.memory_space<vmem>>, vector<128x128xbf16>
    tpu.vector_store %arg5[%c0_7, %c0_8], %8 {strides = array<i32>} : memref<128x128xbf16, #tpu.memory_space<vmem>>, vector<128x128xbf16>,
    return
  }
  func.func @transform_0(%arg0: i32, %arg1: memref<7xi32, #tpu.memory_space<smem>>) -> (i32, i32) {
    %c0_i32 = arith.constant 0 : i32
    %c0_i32_0 = arith.constant 0 : i32
    return %arg0, %c0_i32 : i32, i32
  }
  func.func @transform_1(%arg0: i32, %arg1: memref<7xi32, #tpu.memory_space<smem>>) -> (i32, i32, i32) {
    %0 = arith.index_cast %arg0 : i32 to index
    %1 = memref.load %arg1[%0] : memref<7xi32, #tpu.memory_space<smem>>
    %c0_i32 = arith.constant 0 : i32
    %c0_i32_0 = arith.constant 0 : i32
    %c0_i32_1 = arith.constant 0 : i32
    return %1, %c0_i32, %c0_i32_0 : i32, i32, i32
  }
  func.func @transform_2(%arg0: i32, %arg1: memref<7xi32, #tpu.memory_space<smem>>) -> (i32, i32, i32) {
    %0 = arith.index_cast %arg0 : i32 to index
    %1 = memref.load %arg1[%0] : memref<7xi32, #tpu.memory_space<smem>>
    %c0_i32 = arith.constant 0 : i32
    %c0_i32_0 = arith.constant 0 : i32
    %c0_i32_1 = arith.constant 0 : i32
    return %1, %c0_i32, %c0_i32_0 : i32, i32, i32
  }
  func.func @transform_3(%arg0: i32, %arg1: memref<7xi32, #tpu.memory_space<smem>>) -> (i32, i32) {
    %c0_i32 = arith.constant 0 : i32
    %c0_i32_0 = arith.constant 0 : i32
    return %arg0, %c0_i32 : i32, i32
  }
}

module attributes {stable_mosaic.version = 11 : i64} {
  func.func @_group_conv_kernel(%arg0: i32, %arg1: memref<7xi32, #tpu.memory_space<smem>>, %arg2: memref<128x80xbf16, #tpu.memory_space<vmem>>, %arg3: memref<1x80x128xbf16, #tpu.memory_space<vmem>>, %arg4: memref<1x1x128xf32, #tpu.memory_space<vmem>>, %arg5: memref<128x128xf32, #tpu.memory_space<vmem>>) attributes {dimension_semantics = [#tpu.dimension_semantics<parallel>], iteration_bounds = array<i64: 7>, scalar_prefetch = 1 : i64, scratch_operands = 0 : i64, tpu.core_type = #tpu.core_type<tc>, window_params = [{transform_indices = @transform_0, window_bounds = array<i64: 128, 80>}, {transform_indices = @transform_1, window_bounds = array<i64: 1, 80, 128>}, {transform_indices = @transform_2, window_bounds = array<i64: 1, 1, 128>}, {transform_indices = @transform_3, window_bounds = array<i64: 128, 128>}]} {
    %c0 = arith.constant 0 : index
    %c0_0 = arith.constant 0 : index
    %0 = vector.load %arg2[%c0, %c0_0] : memref<128x80xbf16, #tpu.memory_space<vmem>>, vector<128x80xbf16>
    %c0_1 = arith.constant 0 : index
    %c0_2 = arith.constant 0 : index
    %c0_3 = arith.constant 0 : index
    %1 = vector.load %arg3[%c0_1, %c0_2, %c0_3] : memref<1x80x128xbf16, #tpu.memory_space<vmem>>, vector<1x80x128xbf16>
    %2 = vector.shape_cast %1 : vector<1x80x128xbf16> to vector<80x128xbf16>
    %cst = arith.constant dense<0.000000e+00> : vector<128x128xf32>
    %3 = tpu.matmul %0, %2, %cst {dimension_numbers = #tpu.dot_dimension_numbers<[1], [0], [0], [1], [0, 0, 1, 1], [], []>} : vector<128x80xbf16>, vector<80x128xbf16>, vector<128x128xf32> -> vector<128x128xf32>
    %c0_4 = arith.constant 0 : index
    %c0_5 = arith.constant 0 : index
    %c0_6 = arith.constant 0 : index
    %4 = vector.load %arg4[%c0_4, %c0_5, %c0_6] : memref<1x1x128xf32, #tpu.memory_space<vmem>>, vector<1x1x128xf32>
    %5 = vector.shape_cast %4 : vector<1x1x128xf32> to vector<1x128xf32>
    %6 = vector.broadcast %5 : vector<1x128xf32> to vector<128x128xf32>
    %7 = arith.addf %3, %6 : vector<128x128xf32>
    %c0_7 = arith.constant 0 : index
    %c0_8 = arith.constant 0 : index
    %8 = vector.load %arg5[%c0_7, %c0_8] : memref<128x128xf32, #tpu.memory_space<vmem>>, vector<128x128xf32>
    tpu.vector_store %arg5[%c0_7, %c0_8], %7 {strides = array<i32>} : memref<128x128xf32, #tpu.memory_space<vmem>>, vector<128x128xf32>,
    return
  }
  func.func @transform_0(%arg0: i32, %arg1: memref<7xi32, #tpu.memory_space<smem>>) -> (i32, i32) {
    %c0_i32 = arith.constant 0 : i32
    %c0_i32_0 = arith.constant 0 : i32
    return %arg0, %c0_i32 : i32, i32
  }
  func.func @transform_1(%arg0: i32, %arg1: memref<7xi32, #tpu.memory_space<smem>>) -> (i32, i32, i32) {
    %0 = arith.index_cast %arg0 : i32 to index
    %1 = memref.load %arg1[%0] : memref<7xi32, #tpu.memory_space<smem>>
    %c0_i32 = arith.constant 0 : i32
    %c0_i32_0 = arith.constant 0 : i32
    %c0_i32_1 = arith.constant 0 : i32
    return %1, %c0_i32, %c0_i32_0 : i32, i32, i32
  }
  func.func @transform_2(%arg0: i32, %arg1: memref<7xi32, #tpu.memory_space<smem>>) -> (i32, i32, i32) {
    %0 = arith.index_cast %arg0 : i32 to index
    %1 = memref.load %arg1[%0] : memref<7xi32, #tpu.memory_space<smem>>
    %c0_i32 = arith.constant 0 : i32
    %c0_i32_0 = arith.constant 0 : i32
    %c0_i32_1 = arith.constant 0 : i32
    return %1, %c0_i32, %c0_i32_0 : i32, i32, i32
  }
  func.func @transform_3(%arg0: i32, %arg1: memref<7xi32, #tpu.memory_space<smem>>) -> (i32, i32) {
    %c0_i32 = arith.constant 0 : i32
    %c0_i32_0 = arith.constant 0 : i32
    return %arg0, %c0_i32 : i32, i32
  }
}

module attributes {stable_mosaic.version = 11 : i64} {
  func.func @_group_conv_kernel(%arg0: i32, %arg1: memref<1xi32, #tpu.memory_space<smem>>, %arg2: memref<8x288xbf16, #tpu.memory_space<vmem>>, %arg3: memref<1x288x128xbf16, #tpu.memory_space<vmem>>, %arg4: memref<1x1x128xf32, #tpu.memory_space<vmem>>, %arg5: memref<8x128xf32, #tpu.memory_space<vmem>>) attributes {dimension_semantics = [#tpu.dimension_semantics<parallel>], iteration_bounds = array<i64: 1>, scalar_prefetch = 1 : i64, scratch_operands = 0 : i64, tpu.core_type = #tpu.core_type<tc>, window_params = [{transform_indices = @transform_0, window_bounds = array<i64: 8, 288>}, {transform_indices = @transform_1, window_bounds = array<i64: 1, 288, 128>}, {transform_indices = @transform_2, window_bounds = array<i64: 1, 1, 128>}, {transform_indices = @transform_3, window_bounds = array<i64: 8, 128>}]} {
    %c0 = arith.constant 0 : index
    %c0_0 = arith.constant 0 : index
    %0 = vector.load %arg2[%c0, %c0_0] : memref<8x288xbf16, #tpu.memory_space<vmem>>, vector<8x288xbf16>
    %c0_1 = arith.constant 0 : index
    %c0_2 = arith.constant 0 : index
    %c0_3 = arith.constant 0 : index
    %1 = vector.load %arg3[%c0_1, %c0_2, %c0_3] : memref<1x288x128xbf16, #tpu.memory_space<vmem>>, vector<1x288x128xbf16>
    %2 = vector.shape_cast %1 : vector<1x288x128xbf16> to vector<288x128xbf16>
    %cst = arith.constant dense<0.000000e+00> : vector<8x128xf32>
    %3 = tpu.matmul %0, %2, %cst {dimension_numbers = #tpu.dot_dimension_numbers<[1], [0], [0], [1], [0, 0, 1, 1], [], []>} : vector<8x288xbf16>, vector<288x128xbf16>, vector<8x128xf32> -> vector<8x128xf32>
    %c0_4 = arith.constant 0 : index
    %c0_5 = arith.constant 0 : index
    %c0_6 = arith.constant 0 : index
    %4 = vector.load %arg4[%c0_4, %c0_5, %c0_6] : memref<1x1x128xf32, #tpu.memory_space<vmem>>, vector<1x1x128xf32>
    %5 = vector.shape_cast %4 : vector<1x1x128xf32> to vector<1x128xf32>
    %6 = vector.broadcast %5 : vector<1x128xf32> to vector<8x128xf32>
    %7 = arith.addf %3, %6 : vector<8x128xf32>
    %c0_7 = arith.constant 0 : index
    %c0_8 = arith.constant 0 : index
    %8 = vector.load %arg5[%c0_7, %c0_8] : memref<8x128xf32, #tpu.memory_space<vmem>>, vector<8x128xf32>
    tpu.vector_store %arg5[%c0_7, %c0_8], %7 {strides = array<i32>} : memref<8x128xf32, #tpu.memory_space<vmem>>, vector<8x128xf32>,
    return
  }
  func.func @transform_0(%arg0: i32, %arg1: memref<1xi32, #tpu.memory_space<smem>>) -> (i32, i32) {
    %c0_i32 = arith.constant 0 : i32
    %c0_i32_0 = arith.constant 0 : i32
    return %arg0, %c0_i32 : i32, i32
  }
  func.func @transform_1(%arg0: i32, %arg1: memref<1xi32, #tpu.memory_space<smem>>) -> (i32, i32, i32) {
    %0 = arith.index_cast %arg0 : i32 to index
    %1 = memref.load %arg1[%0] : memref<1xi32, #tpu.memory_space<smem>>
    %c0_i32 = arith.constant 0 : i32
    %c0_i32_0 = arith.constant 0 : i32
    %c0_i32_1 = arith.constant 0 : i32
    return %1, %c0_i32, %c0_i32_0 : i32, i32, i32
  }
  func.func @transform_2(%arg0: i32, %arg1: memref<1xi32, #tpu.memory_space<smem>>) -> (i32, i32, i32) {
    %0 = arith.index_cast %arg0 : i32 to index
    %1 = memref.load %arg1[%0] : memref<1xi32, #tpu.memory_space<smem>>
    %c0_i32 = arith.constant 0 : i32
    %c0_i32_0 = arith.constant 0 : i32
    %c0_i32_1 = arith.constant 0 : i32
    return %1, %c0_i32, %c0_i32_0 : i32, i32, i32
  }
  func.func @transform_3(%arg0: i32, %arg1: memref<1xi32, #tpu.memory_space<smem>>) -> (i32, i32) {
    %c0_i32 = arith.constant 0 : i32
    %c0_i32_0 = arith.constant 0 : i32
    return %arg0, %c0_i32 : i32, i32
  }
}

</mosaic_0001>

<bundles_post_ra>
// kernel: backbone_with_fpn_forward.7
= control target key start
LH: loop header
LB: loop body
LE: loop exit
PB: predicated region body
PF: predicated region fallthrough
CT: control target
= control target key end

     0   :  { %s1309_s0 = inlined_call_operand.vmem [shape: s32[2], index: 0, kind: input, shape index: {}]   ;;  %s1310_s1 = inlined_call_operand.vmem [shape: bf16[512,32], index: 1, kind: input, shape index: {}]   ;;  %s1311_s2 = inlined_call_operand.vmem [shape: bf16[1,32,128], index: 2, kind: input, shape index: {}]   ;;  %s1312_s3 = inlined_call_operand.vmem [shape: f32[1,1,128], index: 3, kind: input, shape index: {}]   ;;  %s1313_s4 = inlined_call_operand.vmem [shape: bf16[512,128], index: 4, kind: output, shape index: {}]  }
   0x1   :  { %s9_s17 = sshll.u32 %s1309_s0, 4  ;;  %s10_s17 = int_to_ptr.vmem [resolvable:$true] %s9_s17 }
   0x2   :  { %s1137_s18 = scalar_lea.vmem %s10_s17, 16  ;;  %p1142_p1 = scmp.lt.s32.totalorder %s10_s17, %s10_s17 }
   0x3   :  { %p1138_p0 = scmp.ne.s32.totalorder %s10_s17, %s1137_s18  ;;  %p1143_p2 = scmp.lt.s32.totalorder %s1137_s18, %s1137_s18 }
   0x5   :  { %p1144_p3 = por %p1143_p2, %p1142_p1 }
   0x7   :  { %p1145_p4 = pnand %p1144_p3, %p1138_p0 }
   0x9   :  { %1148 = shalt.err (!%p1145_p4)  }
   0xa   :  { %s1159_s19 = smov [#allocation3]  }
   0xb   :  { %12 = dma.vmem_to_smem %s10_s17, 16, %s1159_s19, [#allocation2] }
   0xc   :  { %1153 = dma.done.wait [#allocation2], 16 }
   0xd   :  { %1154 = vsyncadd [#allocation2], 4294967280 }
   0xe   :  { %14 = sfence }
   0xf   :  { %s1188_s20 = smov 0  }
  0x10 LB: > { %s1194_s0 = sadd.s32 4294967295, %s1157_s20   ;;  %p848_p5 = scmp.ge.s32.totalorder %s1157_s20, 1  ;;  %s1157_s20 = sphi %s1188_s20, %s20_s20  }
  0x11   : > { %p171_p6 = scmp.lt.s32.totalorder %s1157_s20, 3 }
  0x13   : > { %p172_p7 = pnand %p848_p5, %p171_p6 }
  0x14   : > { %s211_s21 = sld [smem:[#allocation3 + %s1194_s0]] (!%p172_p7)  ;;  %s849_s22 = sshll.u32 (!%p172_p7), %s1194_s0, 5  ;;  %vm365_vm0 = vcmask (!%p172_p7), 261120  }
  0x15   : > { %175 = sbr.rel (%p172_p7) target bundleno = 288 (0x120), region = 32  ;;  %p206_p8 = scmp.lt.s32.totalorder (!%p172_p7), %s849_s22, 63 }
  0x16   : > { %s218_s5 = sld [smem:[#allocation3 + %s1194_s0]] (!%p172_p7) }
  0x1a   : > { %p212_p9 = scmp.lt.s32.totalorder (!%p172_p7), %s211_s21, 0 }
  0x1c   : > { %s1315_s22 = smov (!%p206_p8, %s849_s22), 63  ;;  %s1317_s21 = smov (!%p212_p9, %s211_s21), 0 }
  0x1d   : > { %s850_s23 = sshll.u32 %s1315_s22, 2  ;;  %s924_s27 = sshll.u32 %s1317_s21, 4 }
  0x1e   : > { %s1208_s26 = scalar_lea.vmem %s1310_s1, %s850_s23  ;;  %s216_s30 = scalar_lea.vmem %s1311_s2, %s924_s27 }
  0x1f   : > { %v1121_v0 = vld [vmem:[%s1208_s26] sm:$0xff]   ;;  %v1120_v3 = vld [vmem:[%s216_s30 + $0x8] sm:$0xff]   ;;  %v1125_v6 = vld [vmem:[%s1208_s26 + $0x10] sm:$0xff]   ;;  %p219_p10 = scmp.lt.s32.totalorder %s218_s5, 0  ;;  %s1264_s11 = scalar_lea.vmem %s1313_s4, %s850_s23 }
  0x20   : > { %v1122_v1 = vld [vmem:[%s1208_s26 + $0x40] sm:$0xff]   ;;  %1074 = vmatprep.mubr.msk.bf16.mxu0 %vm365_vm0, %v1121_v0  ;;  %v1123_v4 = vld [vmem:[%s1208_s26 + $0x8] sm:$0xff]   ;;  %v1126_v7 = vld [vmem:[%s1208_s26 + $0x50] sm:$0xff]  }
  0x21   : > { %1090 = vmatprep.mubr.msk.bf16.mxu1 %vm365_vm0, %v1122_v1  ;;  %v1119_v2 = vld [vmem:[%s216_s30] sm:$0xff]   ;;  %v1124_v5 = vld [vmem:[%s1208_s26 + $0x48] sm:$0xff]   ;;  %v1127_v8 = vld [vmem:[%s1208_s26 + $0x18] sm:$0xff]   ;;  %s1319_s5 = smov (!%p219_p10, %s218_s5), 0 }
  0x22   : > { %1070 = vmatprep.subr.bf16.mxu0 %v1119_v2  ;;  %1106 = vmatprep.subr.bf16.mxu1 %v1119_v2  ;;  %v1128_v9 = vld [vmem:[%s1208_s26 + $0x58] sm:$0xff]   ;;  %v1129_v10 = vld [vmem:[%s1208_s26 + $0x20] sm:$0xff]   ;;  %v1131_v12 = vld [vmem:[%s1208_s26 + $0x28] sm:$0xff]   ;;  %s221_s8 = scalar_lea.vmem %s1312_s3, %s1319_s5 }
  0x23   : > { %1071 = vmatpush3.bf16.msra.mxu0 %v1119_v2  ;;  %1108 = vmatpush3.bf16.msra.mxu1 %v1119_v2  ;;  %v1130_v11 = vld [vmem:[%s1208_s26 + $0x60] sm:$0xff]   ;;  %v1132_v13 = vld [vmem:[%s1208_s26 + $0x68] sm:$0xff]   ;;  %v1133_v14 = vld [vmem:[%s1208_s26 + $0x30] sm:$0xff]  }
  0x24   : > { %1072 = vmatprep.subr.bf16.mxu0 %v1120_v3  ;;  %1107 = vmatprep.subr.bf16.mxu1 %v1120_v3  ;;  %v1134_v15 = vld [vmem:[%s1208_s26 + $0x70] sm:$0xff]   ;;  %v1135_v16 = vld [vmem:[%s1208_s26 + $0x38] sm:$0xff]   ;;  %v1249_v18 = vld [vmem:[%s221_s8] ss:$0 sm:$0xff] }
  0x25   : > { %v1136_v17 = vld [vmem:[%s1208_s26 + $0x78] sm:$0xff]  }
  0x27   : > { %1073 = vmatpush3.bf16.msra.mxu0 %v1120_v3  ;;  %1109 = vmatpush3.bf16.msra.mxu1 %v1120_v3 }
  0x2a   : > { %1075 = vmatmul.mubr.msk.bf16.vlgmr.msra.gmra.mrb[0].mxu0 %vm365_vm0, %v1123_v4  ;;  %1091 = vmatmul.mubr.msk.bf16.vlgmr.msra.gmra.mrb[0].mxu1 %vm365_vm0, %v1124_v5 }
  0x2b   : > { %1078 = vmatprep.mubr.msk.bf16.mxu0 %vm365_vm0, %v1125_v6  ;;  %1094 = vmatprep.mubr.msk.bf16.mxu1 %vm365_vm0, %v1126_v7 }
  0x32   : > { %1079 = vmatmul.mubr.msk.bf16.gmra.mrb[4].mxu0 %vm365_vm0, %v1127_v8  ;;  %1095 = vmatmul.mubr.msk.bf16.gmra.mrb[4].mxu1 %vm365_vm0, %v1128_v9 }
  0x33   : > { %1082 = vmatprep.mubr.msk.bf16.mxu0 %vm365_vm0, %v1129_v10  ;;  %1098 = vmatprep.mubr.msk.bf16.mxu1 %vm365_vm0, %v1130_v11 }
  0x3a   : > { %1083 = vmatmul.mubr.msk.bf16.gmra.mrb[8].mxu0 %vm365_vm0, %v1131_v12  ;;  %1099 = vmatmul.mubr.msk.bf16.gmra.mrb[8].mxu1 %vm365_vm0, %v1132_v13 }
  0x3b   : > { %1086 = vmatprep.mubr.msk.bf16.mxu0 %vm365_vm0, %v1133_v14  ;;  %1102 = vmatprep.mubr.msk.bf16.mxu1 %vm365_vm0, %v1134_v15 }
  0x42   : > { %1087 = vmatmul.mubr.msk.bf16.gmra.mrb[12].mxu0 %vm365_vm0, %v1135_v16  ;;  %1103 = vmatmul.mubr.msk.bf16.gmra.mrb[12].mxu1 %vm365_vm0, %v1136_v17 }
  0xfd   : > { %v1076_v19 = vpop.f32.mrb[0].mxu0  ;;  %v1092_v20 = vpop.f32.mrb[0].mxu1 }
  0xfe   : > { %v457_v21 = vadd.f32 %v1076_v19, %v1249_v18  ;;  %v521_v22 = vadd.f32 %v1092_v20, %v1249_v18  ;;  %v448_v23 = vpop.f32.mrb[1].mxu0  ;;  %v512_v24 = vpop.f32.mrb[1].mxu1 }
  0xff   : > { %v449_v25 = vadd.f32 %v1249_v18, %v448_v23  ;;  %v513_v26 = vadd.f32 %v1249_v18, %v512_v24  ;;  %v1077_v27 = vpop.f32.mrb[2].mxu0  ;;  %v1093_v28 = vpop.f32.mrb[2].mxu1 }
 0x100   : > { %v460_v29 = vadd.f32 %v1077_v27, %v1249_v18  ;;  %v524_v30 = vadd.f32 %v1093_v28, %v1249_v18  ;;  %v451_v31 = vpop.f32.mrb[3].mxu0  ;;  %v515_v32 = vpop.f32.mrb[3].mxu1  ;;  %v577_v35 = vmax.f32 %v457_v21, 0.0  ;;  %v593_v36 = vmax.f32 %v521_v22, 0.0 }
 0x101   : > { %v452_v33 = vadd.f32 %v1249_v18, %v451_v31  ;;  %v516_v34 = vadd.f32 %v1249_v18, %v515_v32  ;;  %v575_v39 = vmax.f32 %v449_v25, 0.0  ;;  %v591_v40 = vmax.f32 %v513_v26, 0.0 }
 0x102   : > { %v578_v37 = vmax.f32 %v460_v29, 0.0  ;;  %v594_v38 = vmax.f32 %v524_v30, 0.0 }
 0x103   : > { %v576_v41 = vmax.f32 %v452_v33, 0.0  ;;  %v592_v42 = vmax.f32 %v516_v34, 0.0 }
 0x104   : > { %v965_v43 = vpack.c.bf16 %v578_v37, %v577_v35  ;;  %v1005_v44 = vpack.c.bf16 %v594_v38, %v593_v36 }
 0x105   : > { %v960_v45 = vpack.c.bf16 %v576_v41, %v575_v39  ;;  %v1000_v46 = vpack.c.bf16 %v592_v42, %v591_v40  ;;  %v1080_v47 = vpop.f32.mrb[4].mxu0  ;;  %v1096_v48 = vpop.f32.mrb[4].mxu1 }
 0x106   : > { %1037 = vst [vmem:[%s1264_s11 + $0x8] sm:$0xff] %v965_v43   ;;  %1045 = vst [vmem:[%s1264_s11 + $0x48] sm:$0xff] %v1005_v44   ;;  %v473_v49 = vadd.f32 %v1080_v47, %v1249_v18  ;;  %v537_v50 = vadd.f32 %v1096_v48, %v1249_v18  ;;  %v464_v51 = vpop.f32.mrb[5].mxu0  ;;  %v528_v52 = vpop.f32.mrb[5].mxu1 }
 0x107   : > { %961 = vst [vmem:[%s1264_s11] sm:$0xff] %v960_v45   ;;  %1044 = vst [vmem:[%s1264_s11 + $0x40] sm:$0xff] %v1000_v46   ;;  %v465_v53 = vadd.f32 %v1249_v18, %v464_v51  ;;  %v529_v54 = vadd.f32 %v1249_v18, %v528_v52  ;;  %v1081_v55 = vpop.f32.mrb[6].mxu0  ;;  %v1097_v56 = vpop.f32.mrb[6].mxu1 }
 0x108   : > { %v476_v57 = vadd.f32 %v1081_v55, %v1249_v18  ;;  %v540_v58 = vadd.f32 %v1097_v56, %v1249_v18  ;;  %v467_v59 = vpop.f32.mrb[7].mxu0  ;;  %v531_v60 = vpop.f32.mrb[7].mxu1  ;;  %v581_v63 = vmax.f32 %v473_v49, 0.0  ;;  %v597_v0 = vmax.f32 %v537_v50, 0.0 }
 0x109   : > { %v468_v61 = vadd.f32 %v1249_v18, %v467_v59  ;;  %v532_v62 = vadd.f32 %v1249_v18, %v531_v60  ;;  %v579_v3 = vmax.f32 %v465_v53, 0.0  ;;  %v595_v4 = vmax.f32 %v529_v54, 0.0 }
 0x10a   : > { %v582_v1 = vmax.f32 %v476_v57, 0.0  ;;  %v598_v2 = vmax.f32 %v540_v58, 0.0 }
 0x10b   : > { %v580_v5 = vmax.f32 %v468_v61, 0.0  ;;  %v596_v6 = vmax.f32 %v532_v62, 0.0 }
 0x10c   : > { %v975_v7 = vpack.c.bf16 %v582_v1, %v581_v63  ;;  %v1015_v8 = vpack.c.bf16 %v598_v2, %v597_v0 }
 0x10d   : > { %v970_v9 = vpack.c.bf16 %v580_v5, %v579_v3  ;;  %v1010_v10 = vpack.c.bf16 %v596_v6, %v595_v4  ;;  %v1084_v11 = vpop.f32.mrb[8].mxu0  ;;  %v1100_v12 = vpop.f32.mrb[8].mxu1 }
 0x10e   : > { %1039 = vst [vmem:[%s1264_s11 + $0x18] sm:$0xff] %v975_v7   ;;  %1047 = vst [vmem:[%s1264_s11 + $0x58] sm:$0xff] %v1015_v8   ;;  %v489_v13 = vadd.f32 %v1084_v11, %v1249_v18  ;;  %v553_v14 = vadd.f32 %v1100_v12, %v1249_v18  ;;  %v480_v15 = vpop.f32.mrb[9].mxu0  ;;  %v544_v16 = vpop.f32.mrb[9].mxu1 }
 0x10f   : > { %1038 = vst [vmem:[%s1264_s11 + $0x10] sm:$0xff] %v970_v9   ;;  %1046 = vst [vmem:[%s1264_s11 + $0x50] sm:$0xff] %v1010_v10   ;;  %v481_v17 = vadd.f32 %v1249_v18, %v480_v15  ;;  %v545_v19 = vadd.f32 %v1249_v18, %v544_v16  ;;  %v1085_v20 = vpop.f32.mrb[10].mxu0  ;;  %v1101_v21 = vpop.f32.mrb[10].mxu1 }
 0x110   : > { %v492_v22 = vadd.f32 %v1085_v20, %v1249_v18  ;;  %v556_v23 = vadd.f32 %v1101_v21, %v1249_v18  ;;  %v483_v24 = vpop.f32.mrb[11].mxu0  ;;  %v547_v25 = vpop.f32.mrb[11].mxu1  ;;  %v585_v28 = vmax.f32 %v489_v13, 0.0  ;;  %v601_v29 = vmax.f32 %v553_v14, 0.0 }
 0x111   : > { %v484_v26 = vadd.f32 %v1249_v18, %v483_v24  ;;  %v548_v27 = vadd.f32 %v1249_v18, %v547_v25  ;;  %v583_v32 = vmax.f32 %v481_v17, 0.0  ;;  %v599_v33 = vmax.f32 %v545_v19, 0.0 }
 0x112   : > { %v586_v30 = vmax.f32 %v492_v22, 0.0  ;;  %v602_v31 = vmax.f32 %v556_v23, 0.0 }
 0x113   : > { %v584_v34 = vmax.f32 %v484_v26, 0.0  ;;  %v600_v35 = vmax.f32 %v548_v27, 0.0 }
 0x114   : > { %v985_v36 = vpack.c.bf16 %v586_v30, %v585_v28  ;;  %v1025_v37 = vpack.c.bf16 %v602_v31, %v601_v29 }
 0x115   : > { %v980_v38 = vpack.c.bf16 %v584_v34, %v583_v32  ;;  %v1020_v39 = vpack.c.bf16 %v600_v35, %v599_v33  ;;  %v1088_v40 = vpop.f32.mrb[12].mxu0  ;;  %v1104_v41 = vpop.f32.mrb[12].mxu1 }
 0x116   : > { %1041 = vst [vmem:[%s1264_s11 + $0x28] sm:$0xff] %v985_v36   ;;  %1049 = vst [vmem:[%s1264_s11 + $0x68] sm:$0xff] %v1025_v37   ;;  %v505_v42 = vadd.f32 %v1088_v40, %v1249_v18  ;;  %v569_v43 = vadd.f32 %v1104_v41, %v1249_v18  ;;  %v496_v44 = vpop.f32.mrb[13].mxu0  ;;  %v560_v45 = vpop.f32.mrb[13].mxu1 }
 0x117   : > { %1040 = vst [vmem:[%s1264_s11 + $0x20] sm:$0xff] %v980_v38   ;;  %1048 = vst [vmem:[%s1264_s11 + $0x60] sm:$0xff] %v1020_v39   ;;  %v497_v46 = vadd.f32 %v1249_v18, %v496_v44  ;;  %v561_v47 = vadd.f32 %v1249_v18, %v560_v45  ;;  %v1089_v48 = vpop.f32.mrb[14].mxu0  ;;  %v1105_v49 = vpop.f32.mrb[14].mxu1 }
 0x118   : > { %v508_v50 = vadd.f32 %v1089_v48, %v1249_v18  ;;  %v572_v51 = vadd.f32 %v1105_v49, %v1249_v18  ;;  %v499_v52 = vpop.f32.mrb[15].mxu0  ;;  %v563_v53 = vpop.f32.mrb[15].mxu1  ;;  %v589_v56 = vmax.f32 %v505_v42, 0.0  ;;  %v605_v57 = vmax.f32 %v569_v43, 0.0 }
 0x119   : > { %v500_v54 = vadd.f32 %v1249_v18, %v499_v52  ;;  %v564_v55 = vadd.f32 %v1249_v18, %v563_v53  ;;  %v587_v60 = vmax.f32 %v497_v46, 0.0  ;;  %v603_v61 = vmax.f32 %v561_v47, 0.0 }
 0x11a   : > { %v590_v58 = vmax.f32 %v508_v50, 0.0  ;;  %v606_v59 = vmax.f32 %v572_v51, 0.0 }
 0x11b   : > { %v588_v62 = vmax.f32 %v500_v54, 0.0  ;;  %v604_v63 = vmax.f32 %v564_v55, 0.0 }
 0x11c   : > { %v995_v0 = vpack.c.bf16 %v590_v58, %v589_v56  ;;  %v1035_v1 = vpack.c.bf16 %v606_v59, %v605_v57 }
 0x11d   : > { %v990_v2 = vpack.c.bf16 %v588_v62, %v587_v60  ;;  %v1030_v3 = vpack.c.bf16 %v604_v63, %v603_v61 }
 0x11e   : > { %1043 = vst [vmem:[%s1264_s11 + $0x38] sm:$0xff] %v995_v0   ;;  %1051 = vst [vmem:[%s1264_s11 + $0x78] sm:$0xff] %v1035_v1  }
 0x11f   : > { %1042 = vst [vmem:[%s1264_s11 + $0x30] sm:$0xff] %v990_v2   ;;  %1050 = vst [vmem:[%s1264_s11 + $0x70] sm:$0xff] %v1030_v3  }
 0x120 PF: > { %s20_s20 = sadd.s32 1, %s1157_s20  }
 0x121   : > { %p17_p11 = scmp.ge.s32.totalorder %s20_s20, 4  }
 0x123   :  { %19 = sbr.rel (!%p17_p11) target bundleno = 16 (0x10), region = 68 }

// kernel: backbone_with_fpn_forward.8
= control target key start
LH: loop header
LB: loop body
LE: loop exit
PB: predicated region body
PF: predicated region fallthrough
CT: control target
= control target key end

     0   :  { %vm138_vm0 = vcmask 392192   ;;  %s617_s0 = inlined_call_operand.<no memory space> [shape: s32[1], index: 0, kind: input, shape index: {}]   ;;  %s618_s1 = inlined_call_operand.vmem [shape: bf16[128,48], index: 1, kind: input, shape index: {}]   ;;  %s619_s2 = inlined_call_operand.vmem [shape: bf16[1,48,128], index: 2, kind: input, shape index: {}]   ;;  %s620_s3 = inlined_call_operand.vmem [shape: f32[1,1,128], index: 3, kind: input, shape index: {}]   ;;  %s621_s4 = inlined_call_operand.vmem [shape: bf16[128,128], index: 4, kind: output, shape index: {}]  }
   0x1   :  { %p39_p0 = scmp.lt.s32.totalorder %s617_s0, 0  ;;  %v512_v0 = vld [vmem:[%s618_s1] sm:$0xff]   ;;  %v514_v5 = vld [vmem:[%s618_s1 + $0x8] sm:$0xff]   ;;  %v516_v7 = vld [vmem:[%s618_s1 + $0x10] sm:$0xff]  }
   0x2   :  { %v513_v1 = vld [vmem:[%s618_s1 + $0x20] sm:$0xff]   ;;  %486 = vmatprep.mubr.msk.bf16.mxu0 %vm138_vm0, %v512_v0  ;;  %v515_v6 = vld [vmem:[%s618_s1 + $0x28] sm:$0xff]   ;;  %v517_v8 = vld [vmem:[%s618_s1 + $0x30] sm:$0xff]  }
   0x3   :  { %s623_s0 = smov (!%p39_p0, %s617_s0), 0  ;;  %494 = vmatprep.mubr.msk.bf16.mxu1 %vm138_vm0, %v513_v1  ;;  %v518_v9 = vld [vmem:[%s618_s1 + $0x18] sm:$0xff]  }
   0x4   :  { %s508_s23 = smul.u32 24, %s623_s0  ;;  %v519_v10 = vld [vmem:[%s618_s1 + $0x38] sm:$0xff]   ;;  %s48_s14 = scalar_lea.vmem %s620_s3, %s623_s0 }
   0x5   :  { %v370_v11 = vld [vmem:[%s48_s14] ss:$0 sm:$0xff] }
   0x6   :  { %s43_s26 = scalar_lea.vmem %s619_s2, %s508_s23 }
   0x7   :  { %v509_v2 = vld [vmem:[%s43_s26] sm:$0xff]   ;;  %v510_v3 = vld [vmem:[%s43_s26 + $0x8] sm:$0xff]   ;;  %v511_v4 = vld [vmem:[%s43_s26 + $0x10] sm:$0xff]  }
   0x8   :  { %480 = vmatprep.subr.bf16.mxu0 %v509_v2  ;;  %502 = vmatprep.subr.bf16.mxu1 %v509_v2 }
   0x9   :  { %481 = vmatpush3.bf16.msra.mxu0 %v509_v2  ;;  %505 = vmatpush3.bf16.msra.mxu1 %v509_v2 }
   0xa   :  { %482 = vmatprep.subr.bf16.mxu0 %v510_v3  ;;  %503 = vmatprep.subr.bf16.mxu1 %v510_v3 }
   0xd   :  { %483 = vmatpush3.bf16.msra.mxu0 %v510_v3  ;;  %506 = vmatpush3.bf16.msra.mxu1 %v510_v3 }
   0xe   :  { %484 = vmatprep.subr.bf16.mxu0 %v511_v4  ;;  %504 = vmatprep.subr.bf16.mxu1 %v511_v4 }
  0x11   :  { %485 = vmatpush3.bf16.msra.mxu0 %v511_v4  ;;  %507 = vmatpush3.bf16.msra.mxu1 %v511_v4 }
  0x14   :  { %487 = vmatmul.mubr.msk.bf16.vlgmr.msra.gmra.mrb[0].mxu0 %vm138_vm0, %v514_v5  ;;  %495 = vmatmul.mubr.msk.bf16.vlgmr.msra.gmra.mrb[0].mxu1 %vm138_vm0, %v515_v6 }
  0x15   :  { %490 = vmatprep.mubr.msk.bf16.mxu0 %vm138_vm0, %v516_v7  ;;  %498 = vmatprep.mubr.msk.bf16.mxu1 %vm138_vm0, %v517_v8 }
  0x1c   :  { %491 = vmatmul.mubr.msk.bf16.gmra.mrb[4].mxu0 %vm138_vm0, %v518_v9  ;;  %499 = vmatmul.mubr.msk.bf16.gmra.mrb[4].mxu1 %vm138_vm0, %v519_v10 }
  0xe7   :  { %v488_v12 = vpop.f32.mrb[0].mxu0  ;;  %v496_v13 = vpop.f32.mrb[0].mxu1 }
  0xe8   :  { %v206_v14 = vadd.f32 %v488_v12, %v370_v11  ;;  %v238_v15 = vadd.f32 %v496_v13, %v370_v11  ;;  %v197_v16 = vpop.f32.mrb[1].mxu0  ;;  %v229_v17 = vpop.f32.mrb[1].mxu1 }
  0xe9   :  { %v198_v18 = vadd.f32 %v370_v11, %v197_v16  ;;  %v230_v19 = vadd.f32 %v370_v11, %v229_v17  ;;  %v489_v20 = vpop.f32.mrb[2].mxu0  ;;  %v497_v21 = vpop.f32.mrb[2].mxu1 }
  0xea   :  { %v209_v22 = vadd.f32 %v489_v20, %v370_v11  ;;  %v241_v23 = vadd.f32 %v497_v21, %v370_v11  ;;  %v200_v24 = vpop.f32.mrb[3].mxu0  ;;  %v232_v25 = vpop.f32.mrb[3].mxu1  ;;  %v262_v28 = vmax.f32 %v206_v14, 0.0  ;;  %v270_v29 = vmax.f32 %v238_v15, 0.0 }
  0xeb   :  { %v201_v26 = vadd.f32 %v370_v11, %v200_v24  ;;  %v233_v27 = vadd.f32 %v370_v11, %v232_v25  ;;  %v260_v32 = vmax.f32 %v198_v18, 0.0  ;;  %v268_v33 = vmax.f32 %v230_v19, 0.0 }
  0xec   :  { %v263_v30 = vmax.f32 %v209_v22, 0.0  ;;  %v271_v31 = vmax.f32 %v241_v23, 0.0 }
  0xed   :  { %v261_v34 = vmax.f32 %v201_v26, 0.0  ;;  %v269_v35 = vmax.f32 %v233_v27, 0.0 }
  0xee   :  { %v430_v36 = vpack.c.bf16 %v263_v30, %v262_v28  ;;  %v450_v37 = vpack.c.bf16 %v271_v31, %v270_v29 }
  0xef   :  { %v425_v38 = vpack.c.bf16 %v261_v34, %v260_v32  ;;  %v445_v39 = vpack.c.bf16 %v269_v35, %v268_v33  ;;  %v492_v40 = vpop.f32.mrb[4].mxu0  ;;  %v500_v41 = vpop.f32.mrb[4].mxu1 }
  0xf0   :  { %462 = vst [vmem:[%s621_s4 + $0x8] sm:$0xff] %v430_v36   ;;  %466 = vst [vmem:[%s621_s4 + $0x28] sm:$0xff] %v450_v37   ;;  %v222_v42 = vadd.f32 %v492_v40, %v370_v11  ;;  %v254_v43 = vadd.f32 %v500_v41, %v370_v11  ;;  %v213_v44 = vpop.f32.mrb[5].mxu0  ;;  %v245_v45 = vpop.f32.mrb[5].mxu1 }
  0xf1   :  { %426 = vst [vmem:[%s621_s4] sm:$0xff] %v425_v38   ;;  %465 = vst [vmem:[%s621_s4 + $0x20] sm:$0xff] %v445_v39   ;;  %v214_v46 = vadd.f32 %v370_v11, %v213_v44  ;;  %v246_v47 = vadd.f32 %v370_v11, %v245_v45  ;;  %v493_v48 = vpop.f32.mrb[6].mxu0  ;;  %v501_v49 = vpop.f32.mrb[6].mxu1 }
  0xf2   :  { %v225_v50 = vadd.f32 %v493_v48, %v370_v11  ;;  %v257_v51 = vadd.f32 %v501_v49, %v370_v11  ;;  %v216_v52 = vpop.f32.mrb[7].mxu0  ;;  %v248_v53 = vpop.f32.mrb[7].mxu1  ;;  %v266_v56 = vmax.f32 %v222_v42, 0.0  ;;  %v274_v57 = vmax.f32 %v254_v43, 0.0 }
  0xf3   :  { %v217_v54 = vadd.f32 %v370_v11, %v216_v52  ;;  %v249_v55 = vadd.f32 %v370_v11, %v248_v53  ;;  %v264_v60 = vmax.f32 %v214_v46, 0.0  ;;  %v272_v61 = vmax.f32 %v246_v47, 0.0 }
  0xf4   :  { %v267_v58 = vmax.f32 %v225_v50, 0.0  ;;  %v275_v59 = vmax.f32 %v257_v51, 0.0 }
  0xf5   :  { %v265_v62 = vmax.f32 %v217_v54, 0.0  ;;  %v273_v63 = vmax.f32 %v249_v55, 0.0 }
  0xf6   :  { %v440_v0 = vpack.c.bf16 %v267_v58, %v266_v56  ;;  %v460_v1 = vpack.c.bf16 %v275_v59, %v274_v57 }
  0xf7   :  { %v435_v2 = vpack.c.bf16 %v265_v62, %v264_v60  ;;  %v455_v3 = vpack.c.bf16 %v273_v63, %v272_v61 }
  0xf8   :  { %464 = vst [vmem:[%s621_s4 + $0x18] sm:$0xff] %v440_v0   ;;  %468 = vst [vmem:[%s621_s4 + $0x38] sm:$0xff] %v460_v1  }
  0xf9   :  { %463 = vst [vmem:[%s621_s4 + $0x10] sm:$0xff] %v435_v2   ;;  %467 = vst [vmem:[%s621_s4 + $0x30] sm:$0xff] %v455_v3  }

// kernel: backbone_with_fpn_forward.9
= control target key start
LH: loop header
LB: loop body
LE: loop exit
PB: predicated region body
PF: predicated region fallthrough
CT: control target
= control target key end

     0   :  { %vm112_vm0 = vcmask 654336   ;;  %s315_s0 = inlined_call_operand.<no memory space> [shape: s32[1], index: 0, kind: input, shape index: {}]   ;;  %s316_s1 = inlined_call_operand.vmem [shape: bf16[32,80], index: 1, kind: input, shape index: {}]   ;;  %s317_s2 = inlined_call_operand.vmem [shape: bf16[1,80,128], index: 2, kind: input, shape index: {}]   ;;  %s318_s3 = inlined_call_operand.vmem [shape: f32[1,1,128], index: 3, kind: input, shape index: {}]   ;;  %s319_s4 = inlined_call_operand.vmem [shape: bf16[32,128], index: 4, kind: output, shape index: {}]  }
   0x1   :  { %p39_p0 = scmp.lt.s32.totalorder %s315_s0, 0  ;;  %v262_v0 = vld [vmem:[%s316_s1] sm:$0xff]   ;;  %v263_v6 = vld [vmem:[%s316_s1 + $0x8] sm:$0xff]  }
   0x2   :  { %252 = vmatprep.mubr.msk.bf16.mxu0 %vm112_vm0, %v262_v0 }
   0x3   :  { %s321_s0 = smov (!%p39_p0, %s315_s0), 0 }
   0x4   :  { %s256_s21 = smul.u32 40, %s321_s0  ;;  %s48_s28 = scalar_lea.vmem %s318_s3, %s321_s0 }
   0x5   :  { %v206_v7 = vld [vmem:[%s48_s28] ss:$0 sm:$0xff] }
   0x6   :  { %s43_s24 = scalar_lea.vmem %s317_s2, %s256_s21 }
   0x7   :  { %v257_v1 = vld [vmem:[%s43_s24] sm:$0xff]   ;;  %v258_v2 = vld [vmem:[%s43_s24 + $0x8] sm:$0xff]   ;;  %v259_v3 = vld [vmem:[%s43_s24 + $0x10] sm:$0xff]  }
   0x8   :  { %242 = vmatprep.subr.bf16.mxu0 %v257_v1  ;;  %v260_v4 = vld [vmem:[%s43_s24 + $0x18] sm:$0xff]   ;;  %v261_v5 = vld [vmem:[%s43_s24 + $0x20] sm:$0xff]  }
   0x9   :  { %243 = vmatpush3.bf16.msra.mxu0 %v257_v1 }
   0xa   :  { %244 = vmatprep.subr.bf16.mxu0 %v258_v2 }
   0xd   :  { %245 = vmatpush3.bf16.msra.mxu0 %v258_v2 }
   0xe   :  { %246 = vmatprep.subr.bf16.mxu0 %v259_v3 }
  0x11   :  { %247 = vmatpush3.bf16.msra.mxu0 %v259_v3 }
  0x12   :  { %248 = vmatprep.subr.bf16.mxu0 %v260_v4 }
  0x15   :  { %249 = vmatpush3.bf16.msra.mxu0 %v260_v4 }
  0x16   :  { %250 = vmatprep.subr.bf16.mxu0 %v261_v5 }
  0x19   :  { %251 = vmatpush3.bf16.msra.mxu0 %v261_v5 }
  0x1c   :  { %253 = vmatmul.mubr.msk.bf16.vlgmr.msra.gmra.mrb[0].mxu0 %vm112_vm0, %v263_v6 }
  0xef   :  { %v254_v8 = vpop.f32.mrb[0].mxu0 }
  0xf0   :  { %v162_v9 = vadd.f32 %v254_v8, %v206_v7  ;;  %v153_v10 = vpop.f32.mrb[1].mxu0 }
  0xf1   :  { %v154_v11 = vadd.f32 %v206_v7, %v153_v10  ;;  %v255_v12 = vpop.f32.mrb[2].mxu0 }
  0xf2   :  { %v165_v13 = vadd.f32 %v255_v12, %v206_v7  ;;  %v156_v14 = vpop.f32.mrb[3].mxu0  ;;  %v170_v16 = vmax.f32 %v162_v9, 0.0 }
  0xf3   :  { %v157_v15 = vadd.f32 %v206_v7, %v156_v14  ;;  %v168_v18 = vmax.f32 %v154_v11, 0.0 }
  0xf4   :  { %v171_v17 = vmax.f32 %v165_v13, 0.0 }
  0xf5   :  { %v169_v19 = vmax.f32 %v157_v15, 0.0 }
  0xf6   :  { %v232_v20 = vpack.c.bf16 %v171_v17, %v170_v16 }
  0xf7   :  { %v227_v21 = vpack.c.bf16 %v169_v19, %v168_v18 }
  0xf8   :  { %234 = vst [vmem:[%s319_s4 + $0x8] sm:$0xff] %v232_v20  }
  0xf9   :  { %228 = vst [vmem:[%s319_s4] sm:$0xff] %v227_v21  }

// kernel: backbone_with_fpn_forward.10
= control target key start
LH: loop header
LB: loop body
LE: loop exit
PB: predicated region body
PF: predicated region fallthrough
CT: control target
= control target key end

     0   :  { %v224_v0 = vmov 0   ;;  %vm137_vm0 = vcmask 130048   ;;  %s272_s0 = inlined_call_operand.<no memory space> [shape: s32[1], index: 0, kind: input, shape index: {}]   ;;  %s273_s1 = inlined_call_operand.vmem [shape: bf16[8,144], index: 1, kind: input, shape index: {}]   ;;  %s274_s2 = inlined_call_operand.vmem [shape: bf16[1,144,128], index: 2, kind: input, shape index: {}]   ;;  %s275_s3 = inlined_call_operand.vmem [shape: f32[1,1,128], index: 3, kind: input, shape index: {}]   ;;  %s276_s4 = inlined_call_operand.vmem [shape: bf16[8,128], index: 4, kind: output, shape index: {}]  }
   0x1   :  { %141 = vmatprep.subr.bf16.mxu0 %v224_v0  ;;  %p39_p0 = scmp.lt.s32.totalorder %s272_s0, 0  ;;  %v51_v1 = vld [vmem:[%s273_s1] sm:$0xff] }
   0x2   :  { %v200_v2 = vcombine.high %v51_v1, %v51_v1  ;;  %v199_v12 = vcombine.low %v51_v1, %v51_v1 }
   0x3   :  { %s278_s0 = smov (!%p39_p0, %s272_s0), 0 }
   0x4   :  { %210 = vmatprep.mubr.msk.bf16.mxu0 %vm137_vm0, %v200_v2  ;;  %s211_s21 = smul.u32 72, %s278_s0  ;;  %s48_s25 = scalar_lea.vmem %s275_s3, %s278_s0 }
   0x5   :  { %v198_v13 = vld [vmem:[%s48_s25] ss:$0 sm:$0xff] }
   0x6   :  { %s43_s24 = scalar_lea.vmem %s274_s2, %s211_s21 }
   0x7   :  { %v213_v3 = vld [vmem:[%s43_s24] sm:$0xff]   ;;  %v214_v4 = vld [vmem:[%s43_s24 + $0x8] sm:$0xff]   ;;  %v215_v5 = vld [vmem:[%s43_s24 + $0x10] sm:$0xff]  }
   0x8   :  { %142 = vmatpush1.bf16.msra.mxu0 %v213_v3  ;;  %v216_v6 = vld [vmem:[%s43_s24 + $0x18] sm:$0xff]   ;;  %v217_v7 = vld [vmem:[%s43_s24 + $0x20] sm:$0xff]   ;;  %v218_v8 = vld [vmem:[%s43_s24 + $0x28] sm:$0xff]  }
   0x9   :  { %143 = vmatprep.subr.bf16.mxu0 %v224_v0  ;;  %v219_v9 = vld [vmem:[%s43_s24 + $0x30] sm:$0xff]   ;;  %v220_v10 = vld [vmem:[%s43_s24 + $0x38] sm:$0xff]   ;;  %v221_v11 = vld [vmem:[%s43_s24 + $0x40] sm:$0xff]  }
   0xc   :  { %144 = vmatpush1.bf16.msra.mxu0 %v214_v4 }
   0xd   :  { %145 = vmatprep.subr.bf16.mxu0 %v224_v0 }
  0x10   :  { %146 = vmatpush1.bf16.msra.mxu0 %v215_v5 }
  0x11   :  { %147 = vmatprep.subr.bf16.mxu0 %v224_v0 }
  0x14   :  { %148 = vmatpush1.bf16.msra.mxu0 %v216_v6 }
  0x15   :  { %149 = vmatprep.subr.bf16.mxu0 %v224_v0 }
  0x18   :  { %150 = vmatpush1.bf16.msra.mxu0 %v217_v7 }
  0x19   :  { %151 = vmatprep.subr.bf16.mxu0 %v224_v0 }
  0x1c   :  { %152 = vmatpush1.bf16.msra.mxu0 %v218_v8 }
  0x1d   :  { %153 = vmatprep.subr.bf16.mxu0 %v224_v0 }
  0x20   :  { %154 = vmatpush1.bf16.msra.mxu0 %v219_v9 }
  0x21   :  { %155 = vmatprep.subr.bf16.mxu0 %v224_v0 }
  0x24   :  { %156 = vmatpush1.bf16.msra.mxu0 %v220_v10 }
  0x25   :  { %157 = vmatprep.subr.bf16.mxu0 %v224_v0 }
  0x28   :  { %158 = vmatpush1.bf16.msra.mxu0 %v221_v11 }
  0x2b   :  { %174 = vmatmul.mubr.bf16.vlgmr.msra.gmra.mrb[0].mxu0 %v199_v12 }
  0xfe   :  { %v175_v14 = vpop.f32.mrb[0].mxu0 }
  0xff   :  { %v176_v15 = vadd.f32 %v198_v13, %v175_v14  ;;  %v177_v16 = vpop.f32.mrb[1].mxu0 }
 0x100   :  { %v178_v17 = vpop.f32.mrb[2].mxu0 }
 0x101   :  { %v181_v18 = vmax.f32 %v176_v15, 0.0  ;;  %v179_v19 = vpop.f32.mrb[3].mxu0 }
 0x103   :  { %v182_v20 = vpack.c.bf16 %v181_v18, %v181_v18 }
 0x105   :  { %183 = vst [vmem:[%s276_s4] sm:$0xf] %v182_v20 }

// kernel: backbone_with_fpn_forward.12
= control target key start
LH: loop header
LB: loop body
LE: loop exit
PB: predicated region body
PF: predicated region fallthrough
CT: control target
= control target key end

     0   :  { %s857_s0 = inlined_call_operand.vmem [shape: s32[7], index: 0, kind: input, shape index: {}]   ;;  %s858_s1 = inlined_call_operand.vmem [shape: bf16[896,32], index: 1, kind: input, shape index: {}]   ;;  %s859_s2 = inlined_call_operand.vmem [shape: bf16[4,32,128], index: 2, kind: input, shape index: {}]   ;;  %s860_s3 = inlined_call_operand.vmem [shape: f32[4,1,128], index: 3, kind: input, shape index: {}]   ;;  %s861_s4 = inlined_call_operand.vmem [shape: bf16[896,128], index: 4, kind: output, shape index: {}]  }
   0x1   :  { %s9_s17 = sshll.u32 %s857_s0, 4  ;;  %s10_s17 = int_to_ptr.vmem [resolvable:$true] %s9_s17 }
   0x2   :  { %s753_s18 = scalar_lea.vmem %s10_s17, 16  ;;  %p758_p1 = scmp.lt.s32.totalorder %s10_s17, %s10_s17 }
   0x3   :  { %p754_p0 = scmp.ne.s32.totalorder %s10_s17, %s753_s18  ;;  %p759_p2 = scmp.lt.s32.totalorder %s753_s18, %s753_s18 }
   0x5   :  { %p760_p3 = por %p759_p2, %p758_p1 }
   0x7   :  { %p761_p4 = pnand %p760_p3, %p754_p0 }
   0x9   :  { %764 = shalt.err (!%p761_p4)  }
   0xa   :  { %s775_s19 = smov [#allocation3]  }
   0xb   :  { %12 = dma.vmem_to_smem %s10_s17, 16, %s775_s19, [#allocation2] }
   0xc   :  { %769 = dma.done.wait [#allocation2], 16 }
   0xd   :  { %770 = vsyncadd [#allocation2], 4294967280 }
   0xe   :  { %14 = sfence }
   0xf   :  { %s804_s20 = smov 0  }
  0x10 LB: > { %s810_s0 = sadd.s32 4294967295, %s773_s20   ;;  %p592_p5 = scmp.ge.s32.totalorder %s773_s20, 1  ;;  %s773_s20 = sphi %s804_s20, %s20_s20  }
  0x11   : > { %p171_p6 = scmp.lt.s32.totalorder %s773_s20, 8 }
  0x13   : > { %p172_p7 = pnand %p592_p5, %p171_p6 }
  0x14   : > { %s211_s21 = sld [smem:[#allocation3 + %s810_s0]] (!%p172_p7)  ;;  %s593_s22 = sshll.u32 (!%p172_p7), %s810_s0, 4  ;;  %vm309_vm0 = vcmask (!%p172_p7), 261120  }
  0x15   : > { %175 = sbr.rel (%p172_p7) target bundleno = 270 (0x10e), region = 32  ;;  %p206_p8 = scmp.lt.s32.totalorder (!%p172_p7), %s593_s22, 111 }
  0x16   : > { %s218_s5 = sld [smem:[#allocation3 + %s810_s0]] (!%p172_p7) }
  0x1a   : > { %p212_p9 = scmp.lt.s32.totalorder (!%p172_p7), %s211_s21, 3 }
  0x1c   : > { %s863_s22 = smov (!%p206_p8, %s593_s22), 111  ;;  %s865_s21 = smov (!%p212_p9, %s211_s21), 3 }
  0x1d   : > { %s594_s23 = sshll.u32 %s863_s22, 2  ;;  %s636_s27 = sshll.u32 %s865_s21, 4 }
  0x1e   : > { %s209_s26 = scalar_lea.vmem %s858_s1, %s594_s23  ;;  %s216_s30 = scalar_lea.vmem %s859_s2, %s636_s27 }
  0x1f   : > { %v745_v0 = vld [vmem:[%s209_s26] sm:$0xff]   ;;  %v744_v3 = vld [vmem:[%s216_s30 + $0x8] sm:$0xff]   ;;  %v749_v6 = vld [vmem:[%s209_s26 + $0x10] sm:$0xff]   ;;  %p219_p10 = scmp.lt.s32.totalorder %s218_s5, 3  ;;  %s844_s11 = scalar_lea.vmem %s861_s4, %s594_s23 }
  0x20   : > { %v746_v1 = vld [vmem:[%s209_s26 + $0x20] sm:$0xff]   ;;  %714 = vmatprep.mubr.msk.bf16.mxu0 %vm309_vm0, %v745_v0  ;;  %v747_v4 = vld [vmem:[%s209_s26 + $0x8] sm:$0xff]   ;;  %v750_v7 = vld [vmem:[%s209_s26 + $0x30] sm:$0xff]  }
  0x21   : > { %722 = vmatprep.mubr.msk.bf16.mxu1 %vm309_vm0, %v746_v1  ;;  %v743_v2 = vld [vmem:[%s216_s30] sm:$0xff]   ;;  %v748_v5 = vld [vmem:[%s209_s26 + $0x28] sm:$0xff]   ;;  %v751_v8 = vld [vmem:[%s209_s26 + $0x18] sm:$0xff]   ;;  %s867_s5 = smov (!%p219_p10, %s218_s5), 3 }
  0x22   : > { %710 = vmatprep.subr.bf16.mxu0 %v743_v2  ;;  %730 = vmatprep.subr.bf16.mxu1 %v743_v2  ;;  %v752_v9 = vld [vmem:[%s209_s26 + $0x38] sm:$0xff]   ;;  %s221_s8 = scalar_lea.vmem %s860_s3, %s867_s5 }
  0x23   : > { %711 = vmatpush3.bf16.msra.mxu0 %v743_v2  ;;  %732 = vmatpush3.bf16.msra.mxu1 %v743_v2  ;;  %v599_v11 = vld [vmem:[%s221_s8] ss:$0 sm:$0xff] }
  0x24   : > { %712 = vmatprep.subr.bf16.mxu0 %v744_v3  ;;  %731 = vmatprep.subr.bf16.mxu1 %v744_v3 }
  0x27   : > { %713 = vmatpush3.bf16.msra.mxu0 %v744_v3  ;;  %733 = vmatpush3.bf16.msra.mxu1 %v744_v3 }
  0x2a   : > { %715 = vmatmul.mubr.msk.bf16.vlgmr.msra.gmra.mrb[0].mxu0 %vm309_vm0, %v747_v4  ;;  %723 = vmatmul.mubr.msk.bf16.vlgmr.msra.gmra.mrb[0].mxu1 %vm309_vm0, %v748_v5 }
  0x2b   : > { %718 = vmatprep.mubr.msk.bf16.mxu0 %vm309_vm0, %v749_v6  ;;  %726 = vmatprep.mubr.msk.bf16.mxu1 %vm309_vm0, %v750_v7 }
  0x32   : > { %719 = vmatmul.mubr.msk.bf16.gmra.mrb[4].mxu0 %vm309_vm0, %v751_v8  ;;  %727 = vmatmul.mubr.msk.bf16.gmra.mrb[4].mxu1 %vm309_vm0, %v752_v9 }
  0xfd   : > { %v716_v10 = vpop.f32.mrb[0].mxu0  ;;  %v724_v12 = vpop.f32.mrb[0].mxu1 }
  0xfe   : > { %v368_v13 = vpop.f32.mrb[1].mxu0  ;;  %v400_v14 = vpop.f32.mrb[1].mxu1  ;;  %v377_v17 = vadd.f32 %v716_v10, %v599_v11  ;;  %v409_v18 = vadd.f32 %v724_v12, %v599_v11 }
  0xff   : > { %v717_v15 = vpop.f32.mrb[2].mxu0  ;;  %v725_v16 = vpop.f32.mrb[2].mxu1  ;;  %v369_v23 = vadd.f32 %v599_v11, %v368_v13  ;;  %v401_v24 = vadd.f32 %v599_v11, %v400_v14 }
 0x100   : > { %v380_v19 = vadd.f32 %v717_v15, %v599_v11  ;;  %v412_v20 = vadd.f32 %v725_v16, %v599_v11  ;;  %v371_v21 = vpop.f32.mrb[3].mxu0  ;;  %v403_v22 = vpop.f32.mrb[3].mxu1 }
 0x101   : > { %v372_v25 = vadd.f32 %v599_v11, %v371_v21  ;;  %v404_v26 = vadd.f32 %v599_v11, %v403_v22 }
 0x102   : > { %v661_v27 = vpack.c.bf16 %v380_v19, %v377_v17  ;;  %v681_v28 = vpack.c.bf16 %v412_v20, %v409_v18 }
 0x103   : > { %v656_v29 = vpack.c.bf16 %v372_v25, %v369_v23  ;;  %v676_v30 = vpack.c.bf16 %v404_v26, %v401_v24 }
 0x104   : > { %693 = vst [vmem:[%s844_s11 + $0x8] sm:$0xff] %v661_v27   ;;  %697 = vst [vmem:[%s844_s11 + $0x28] sm:$0xff] %v681_v28  }
 0x105   : > { %657 = vst [vmem:[%s844_s11] sm:$0xff] %v656_v29   ;;  %696 = vst [vmem:[%s844_s11 + $0x20] sm:$0xff] %v676_v30   ;;  %v720_v31 = vpop.f32.mrb[4].mxu0  ;;  %v728_v32 = vpop.f32.mrb[4].mxu1 }
 0x106   : > { %v384_v33 = vpop.f32.mrb[5].mxu0  ;;  %v416_v34 = vpop.f32.mrb[5].mxu1  ;;  %v393_v37 = vadd.f32 %v720_v31, %v599_v11  ;;  %v425_v38 = vadd.f32 %v728_v32, %v599_v11 }
 0x107   : > { %v721_v35 = vpop.f32.mrb[6].mxu0  ;;  %v729_v36 = vpop.f32.mrb[6].mxu1  ;;  %v385_v43 = vadd.f32 %v599_v11, %v384_v33  ;;  %v417_v44 = vadd.f32 %v599_v11, %v416_v34 }
 0x108   : > { %v396_v39 = vadd.f32 %v721_v35, %v599_v11  ;;  %v428_v40 = vadd.f32 %v729_v36, %v599_v11  ;;  %v387_v41 = vpop.f32.mrb[7].mxu0  ;;  %v419_v42 = vpop.f32.mrb[7].mxu1 }
 0x109   : > { %v388_v45 = vadd.f32 %v599_v11, %v387_v41  ;;  %v420_v46 = vadd.f32 %v599_v11, %v419_v42 }
 0x10a   : > { %v671_v47 = vpack.c.bf16 %v396_v39, %v393_v37  ;;  %v691_v48 = vpack.c.bf16 %v428_v40, %v425_v38 }
 0x10b   : > { %v666_v49 = vpack.c.bf16 %v388_v45, %v385_v43  ;;  %v686_v50 = vpack.c.bf16 %v420_v46, %v417_v44 }
 0x10c   : > { %695 = vst [vmem:[%s844_s11 + $0x18] sm:$0xff] %v671_v47   ;;  %699 = vst [vmem:[%s844_s11 + $0x38] sm:$0xff] %v691_v48  }
 0x10d   : > { %694 = vst [vmem:[%s844_s11 + $0x10] sm:$0xff] %v666_v49   ;;  %698 = vst [vmem:[%s844_s11 + $0x30] sm:$0xff] %v686_v50  }
 0x10e PF: > { %s20_s20 = sadd.s32 1, %s773_s20  }
 0x10f   : > { %p17_p11 = scmp.ge.s32.totalorder %s20_s20, 9  }
 0x111   :  { %19 = sbr.rel (!%p17_p11) target bundleno = 16 (0x10), region = 68 }

// kernel: backbone_with_fpn_forward.13
= control target key start
LH: loop header
LB: loop body
LE: loop exit
PB: predicated region body
PF: predicated region fallthrough
CT: control target
= control target key end

     0   :  { %s773_s0 = inlined_call_operand.vmem [shape: s32[7], index: 0, kind: input, shape index: {}]   ;;  %s774_s1 = inlined_call_operand.vmem [shape: bf16[896,80], index: 1, kind: input, shape index: {}]   ;;  %s775_s2 = inlined_call_operand.vmem [shape: bf16[4,80,128], index: 2, kind: input, shape index: {}]   ;;  %s776_s3 = inlined_call_operand.vmem [shape: f32[4,1,128], index: 3, kind: input, shape index: {}]   ;;  %s777_s4 = inlined_call_operand.vmem [shape: f32[896,128], index: 4, kind: output, shape index: {}]  }
   0x1   :  { %s9_s17 = sshll.u32 %s773_s0, 4  ;;  %s10_s17 = int_to_ptr.vmem [resolvable:$true] %s9_s17 }
   0x2   :  { %s654_s18 = scalar_lea.vmem %s10_s17, 16  ;;  %p659_p1 = scmp.lt.s32.totalorder %s10_s17, %s10_s17 }
   0x3   :  { %p655_p0 = scmp.ne.s32.totalorder %s10_s17, %s654_s18  ;;  %p660_p2 = scmp.lt.s32.totalorder %s654_s18, %s654_s18 }
   0x5   :  { %p661_p3 = por %p660_p2, %p659_p1 }
   0x7   :  { %p662_p4 = pnand %p661_p3, %p655_p0 }
   0x9   :  { %665 = shalt.err (!%p662_p4)  }
   0xa   :  { %s676_s19 = smov [#allocation3]  }
   0xb   :  { %12 = dma.vmem_to_smem %s10_s17, 16, %s676_s19, [#allocation2] }
   0xc   :  { %670 = dma.done.wait [#allocation2], 16 }
   0xd   :  { %671 = vsyncadd [#allocation2], 4294967280 }
   0xe   :  { %14 = sfence }
   0xf   :  { %s705_s20 = smov 0  }
  0x10 LB: > { %s711_s0 = sadd.s32 4294967295, %s674_s20   ;;  %p552_p5 = scmp.ge.s32.totalorder %s674_s20, 1  ;;  %s674_s20 = sphi %s705_s20, %s20_s20  }
  0x11   : > { %p171_p6 = scmp.lt.s32.totalorder %s674_s20, 8 }
  0x13   : > { %p172_p7 = pnand %p552_p5, %p171_p6 }
  0x14   : > { %s211_s21 = sld [smem:[#allocation3 + %s711_s0]] (!%p172_p7)  ;;  %s553_s22 = sshll.u32 (!%p172_p7), %s711_s0, 4  ;;  %vm333_vm0 = vcmask (!%p172_p7), 654336  }
  0x15   : > { %175 = sbr.rel (%p172_p7) target bundleno = 280 (0x118), region = 32  ;;  %p206_p8 = scmp.lt.s32.totalorder (!%p172_p7), %s553_s22, 111 }
  0x16   : > { %s218_s5 = sld [smem:[#allocation3 + %s711_s0]] (!%p172_p7) }
  0x1a   : > { %p212_p9 = scmp.lt.s32.totalorder (!%p172_p7), %s211_s21, 3 }
  0x1c   : > { %s779_s22 = smov (!%p206_p8, %s553_s22), 111  ;;  %s781_s21 = smov (!%p212_p9, %s211_s21), 3 }
  0x1d   : > { %s554_s23 = sshll.u32 %s779_s22, 2  ;;  %s631_s27 = smul.u32 40, %s781_s21 }
  0x1e   : > { %s723_s26 = scalar_lea.vmem %s774_s1, %s554_s23  ;;  %p219_p10 = scmp.lt.s32.totalorder %s218_s5, 3 }
  0x1f   : > { %v646_v0 = vld [vmem:[%s723_s26] sm:$0xff]   ;;  %s216_s30 = scalar_lea.vmem %s775_s2, %s631_s27  ;;  %v648_v7 = vld [vmem:[%s723_s26 + $0x8] sm:$0xff]   ;;  %v650_v9 = vld [vmem:[%s723_s26 + $0x10] sm:$0xff]   ;;  %s557_s9 = sshll.u32 %s779_s22, 3 }
  0x20   : > { %v647_v1 = vld [vmem:[%s723_s26 + $0x20] sm:$0xff]   ;;  %605 = vmatprep.mubr.msk.bf16.mxu0 %vm333_vm0, %v646_v0  ;;  %v642_v3 = vld [vmem:[%s216_s30 + $0x8] sm:$0xff]   ;;  %v643_v4 = vld [vmem:[%s216_s30 + $0x10] sm:$0xff]   ;;  %s783_s5 = smov (!%p219_p10, %s218_s5), 3  ;;  %s752_s12 = scalar_lea.vmem %s777_s4, %s557_s9 }
  0x21   : > { %613 = vmatprep.mubr.msk.bf16.mxu1 %vm333_vm0, %v647_v1  ;;  %v641_v2 = vld [vmem:[%s216_s30] sm:$0xff]   ;;  %v644_v5 = vld [vmem:[%s216_s30 + $0x18] sm:$0xff]   ;;  %v649_v8 = vld [vmem:[%s723_s26 + $0x28] sm:$0xff]   ;;  %s221_s8 = scalar_lea.vmem %s776_s3, %s783_s5 }
  0x22   : > { %595 = vmatprep.subr.bf16.mxu0 %v641_v2  ;;  %621 = vmatprep.subr.bf16.mxu1 %v641_v2  ;;  %v645_v6 = vld [vmem:[%s216_s30 + $0x20] sm:$0xff]   ;;  %v651_v10 = vld [vmem:[%s723_s26 + $0x30] sm:$0xff]   ;;  %v652_v11 = vld [vmem:[%s723_s26 + $0x18] sm:$0xff]  }
  0x23   : > { %596 = vmatpush3.bf16.msra.mxu0 %v641_v2  ;;  %626 = vmatpush3.bf16.msra.mxu1 %v641_v2  ;;  %v653_v12 = vld [vmem:[%s723_s26 + $0x38] sm:$0xff]   ;;  %v558_v13 = vld [vmem:[%s221_s8] ss:$0 sm:$0xff] }
  0x24   : > { %597 = vmatprep.subr.bf16.mxu0 %v642_v3  ;;  %622 = vmatprep.subr.bf16.mxu1 %v642_v3 }
  0x27   : > { %598 = vmatpush3.bf16.msra.mxu0 %v642_v3  ;;  %627 = vmatpush3.bf16.msra.mxu1 %v642_v3 }
  0x28   : > { %599 = vmatprep.subr.bf16.mxu0 %v643_v4  ;;  %623 = vmatprep.subr.bf16.mxu1 %v643_v4 }
  0x2b   : > { %600 = vmatpush3.bf16.msra.mxu0 %v643_v4  ;;  %628 = vmatpush3.bf16.msra.mxu1 %v643_v4 }
  0x2c   : > { %601 = vmatprep.subr.bf16.mxu0 %v644_v5  ;;  %624 = vmatprep.subr.bf16.mxu1 %v644_v5 }
  0x2f   : > { %602 = vmatpush3.bf16.msra.mxu0 %v644_v5  ;;  %629 = vmatpush3.bf16.msra.mxu1 %v644_v5 }
  0x30   : > { %603 = vmatprep.subr.bf16.mxu0 %v645_v6  ;;  %625 = vmatprep.subr.bf16.mxu1 %v645_v6 }
  0x33   : > { %604 = vmatpush3.bf16.msra.mxu0 %v645_v6  ;;  %630 = vmatpush3.bf16.msra.mxu1 %v645_v6 }
  0x36   : > { %606 = vmatmul.mubr.msk.bf16.vlgmr.msra.gmra.mrb[0].mxu0 %vm333_vm0, %v648_v7  ;;  %614 = vmatmul.mubr.msk.bf16.vlgmr.msra.gmra.mrb[0].mxu1 %vm333_vm0, %v649_v8 }
  0x37   : > { %609 = vmatprep.mubr.msk.bf16.mxu0 %vm333_vm0, %v650_v9  ;;  %617 = vmatprep.mubr.msk.bf16.mxu1 %vm333_vm0, %v651_v10 }
  0x3e   : > { %610 = vmatmul.mubr.msk.bf16.gmra.mrb[4].mxu0 %vm333_vm0, %v652_v11  ;;  %618 = vmatmul.mubr.msk.bf16.gmra.mrb[4].mxu1 %vm333_vm0, %v653_v12 }
 0x109   : > { %v607_v14 = vpop.f32.mrb[0].mxu0  ;;  %v615_v15 = vpop.f32.mrb[0].mxu1 }
 0x10a   : > { %v401_v16 = vadd.f32 %v607_v14, %v558_v13  ;;  %v433_v17 = vadd.f32 %v615_v15, %v558_v13  ;;  %v392_v18 = vpop.f32.mrb[1].mxu0  ;;  %v424_v19 = vpop.f32.mrb[1].mxu1 }
 0x10b   : > { %v393_v20 = vadd.f32 %v558_v13, %v392_v18  ;;  %v425_v21 = vadd.f32 %v558_v13, %v424_v19  ;;  %v608_v22 = vpop.f32.mrb[2].mxu0  ;;  %v616_v23 = vpop.f32.mrb[2].mxu1 }
 0x10c   : > { %457 = vst [vmem:[%s752_s12 + $0x10] sm:$0xff] %v401_v16  ;;  %465 = vst [vmem:[%s752_s12 + $0x50] sm:$0xff] %v433_v17  ;;  %v404_v24 = vadd.f32 %v608_v22, %v558_v13  ;;  %v436_v25 = vadd.f32 %v616_v23, %v558_v13  ;;  %v395_v26 = vpop.f32.mrb[3].mxu0  ;;  %v427_v27 = vpop.f32.mrb[3].mxu1 }
 0x10d   : > { %455 = vst [vmem:[%s752_s12] sm:$0xff] %v393_v20  ;;  %463 = vst [vmem:[%s752_s12 + $0x40] sm:$0xff] %v425_v21  ;;  %v396_v28 = vadd.f32 %v558_v13, %v395_v26  ;;  %v428_v29 = vadd.f32 %v558_v13, %v427_v27 }
 0x10e   : > { %458 = vst [vmem:[%s752_s12 + $0x18] sm:$0xff] %v404_v24  ;;  %466 = vst [vmem:[%s752_s12 + $0x58] sm:$0xff] %v436_v25 }
 0x10f   : > { %456 = vst [vmem:[%s752_s12 + $0x8] sm:$0xff] %v396_v28  ;;  %464 = vst [vmem:[%s752_s12 + $0x48] sm:$0xff] %v428_v29 }
 0x111   : > { %v611_v30 = vpop.f32.mrb[4].mxu0  ;;  %v619_v31 = vpop.f32.mrb[4].mxu1 }
 0x112   : > { %v417_v32 = vadd.f32 %v611_v30, %v558_v13  ;;  %v449_v33 = vadd.f32 %v619_v31, %v558_v13  ;;  %v408_v34 = vpop.f32.mrb[5].mxu0  ;;  %v440_v35 = vpop.f32.mrb[5].mxu1 }
 0x113   : > { %v409_v36 = vadd.f32 %v558_v13, %v408_v34  ;;  %v441_v37 = vadd.f32 %v558_v13, %v440_v35  ;;  %v612_v38 = vpop.f32.mrb[6].mxu0  ;;  %v620_v39 = vpop.f32.mrb[6].mxu1 }
 0x114   : > { %461 = vst [vmem:[%s752_s12 + $0x30] sm:$0xff] %v417_v32  ;;  %469 = vst [vmem:[%s752_s12 + $0x70] sm:$0xff] %v449_v33  ;;  %v420_v40 = vadd.f32 %v612_v38, %v558_v13  ;;  %v452_v41 = vadd.f32 %v620_v39, %v558_v13  ;;  %v411_v42 = vpop.f32.mrb[7].mxu0  ;;  %v443_v43 = vpop.f32.mrb[7].mxu1 }
 0x115   : > { %459 = vst [vmem:[%s752_s12 + $0x20] sm:$0xff] %v409_v36  ;;  %467 = vst [vmem:[%s752_s12 + $0x60] sm:$0xff] %v441_v37  ;;  %v412_v44 = vadd.f32 %v558_v13, %v411_v42  ;;  %v444_v45 = vadd.f32 %v558_v13, %v443_v43 }
 0x116   : > { %462 = vst [vmem:[%s752_s12 + $0x38] sm:$0xff] %v420_v40  ;;  %470 = vst [vmem:[%s752_s12 + $0x78] sm:$0xff] %v452_v41 }
 0x117   : > { %460 = vst [vmem:[%s752_s12 + $0x28] sm:$0xff] %v412_v44  ;;  %468 = vst [vmem:[%s752_s12 + $0x68] sm:$0xff] %v444_v45 }
 0x118 PF: > { %s20_s20 = sadd.s32 1, %s674_s20  }
 0x119   : > { %p17_p11 = scmp.ge.s32.totalorder %s20_s20, 9  }
 0x11b   :  { %19 = sbr.rel (!%p17_p11) target bundleno = 16 (0x10), region = 68 }

// kernel: backbone_with_fpn_forward.11
= control target key start
LH: loop header
LB: loop body
LE: loop exit
PB: predicated region body
PF: predicated region fallthrough
CT: control target
= control target key end

     0   :  { %v429_v1 = vmov 0.0   ;;  %vm430_vm0 = vmmov 0   ;;  %s511_s0 = inlined_call_operand.<no memory space> [shape: s32[1], index: 0, kind: input, shape index: {}]   ;;  %s512_s1 = inlined_call_operand.vmem [shape: bf16[8,288], index: 1, kind: input, shape index: {}]   ;;  %s513_s2 = inlined_call_operand.vmem [shape: bf16[1,288,128], index: 2, kind: input, shape index: {}]   ;;  %s514_s3 = inlined_call_operand.vmem [shape: f32[1,1,128], index: 3, kind: input, shape index: {}]   ;;  %s515_s4 = inlined_call_operand.hbm [shape: f32[8,128], index: 4, kind: output, shape index: {}]  }
   0x1   :  { %p40_p0 = scmp.lt.s32.totalorder %s511_s0, 0  ;;  %v52_v0 = vld [vmem:[%s512_s1] sm:$0xff]  ;;  %372 = vmatprep.subr.bf16.mxu1 %v429_v1  ;;  %376 = vmatprep.mubr.msk.bf16.mxu1 %vm430_vm0, %v429_v1 }
   0x2   :  { %v326_v2 = vcombine.high %v52_v0, %v52_v0 }
   0x3   :  { %10 = vsyncpa [#allocation5], 0  ;;  %s517_s0 = smov (!%p40_p0, %s511_s0), 0  ;;  %v404_v17 = vld [vmem:[%s512_s1 + $0x8] ss:$0 sps:$4 sm:$0xff]   ;;  %vm215_vm1 = vcmask 261120   ;;  %v325_v22 = vcombine.low %v52_v0, %v52_v0 }
   0x4   :  { %251 = vmatprep.mubr.bf16.mxu0 %v326_v2  ;;  %s380_s21 = smul.u32 144, %s517_s0  ;;  %s49_s27 = scalar_lea.vmem %s514_s3, %s517_s0 }
   0x5   :  { %v324_v29 = vld [vmem:[%s49_s27] ss:$0 sm:$0xff]  ;;  %s431_s28 = smov [#allocation4]  }
   0x6   :  { %s472_s24 = scalar_lea.vmem %s513_s2, %s380_s21  ;;  %s306_s29 = sshll.u32 %s431_s28, 4  ;;  %s307_s29 = int_to_ptr.vmem [resolvable:$true] %s306_s29 }
   0x7   :  { %v384_v3 = vld [vmem:[%s472_s24 + $0x40] sm:$0xff]   ;;  %v386_v5 = vld [vmem:[%s472_s24 + $0x48] sm:$0xff]   ;;  %v388_v7 = vld [vmem:[%s472_s24 + $0x50] sm:$0xff]   ;;  %s405_s30 = scalar_lea.vmem %s307_s29, 128  ;;  %p410_p2 = scmp.lt.s32.totalorder %s307_s29, %s307_s29 }
   0x8   :  { %v385_v4 = vld [vmem:[%s472_s24] sm:$0xff]   ;;  %347 = vmatprep.subr.bf16.mxu0 %v384_v3  ;;  %v387_v6 = vld [vmem:[%s472_s24 + $0x8] sm:$0xff]   ;;  %v389_v8 = vld [vmem:[%s472_s24 + $0x10] sm:$0xff]   ;;  %p406_p1 = scmp.ne.s32.totalorder %s307_s29, %s405_s30  ;;  %p411_p3 = scmp.lt.s32.totalorder %s405_s30, %s405_s30 }
   0x9   :  { %348 = vmatpush3.bf16.msra.mxu0 %v385_v4  ;;  %v390_v9 = vld [vmem:[%s472_s24 + $0x58] sm:$0xff]   ;;  %v392_v11 = vld [vmem:[%s472_s24 + $0x60] sm:$0xff]   ;;  %v394_v14 = vld [vmem:[%s472_s24 + $0x68] sm:$0xff]  }
   0xa   :  { %349 = vmatprep.subr.bf16.mxu0 %v386_v5  ;;  %v391_v10 = vld [vmem:[%s472_s24 + $0x18] sm:$0xff]   ;;  %v398_v12 = vld [vmem:[%s472_s24 + $0x80] sm:$0xff]   ;;  %v403_v15 = vld [vmem:[%s472_s24 + $0x88] sm:$0xff]   ;;  %p412_p4 = por %p411_p3, %p410_p2 }
   0xb   :  { %v393_v13 = vld [vmem:[%s472_s24 + $0x20] sm:$0xff]   ;;  %373 = vmatpush3.bf16.msra.mxu1 %v398_v12  ;;  %v395_v16 = vld [vmem:[%s472_s24 + $0x28] sm:$0xff]   ;;  %v396_v18 = vld [vmem:[%s472_s24 + $0x70] sm:$0xff]  }
   0xc   :  { %374 = vmatprep.subr.bf16.mxu1 %v429_v1  ;;  %v397_v19 = vld [vmem:[%s472_s24 + $0x30] sm:$0xff]   ;;  %v399_v20 = vld [vmem:[%s472_s24 + $0x78] sm:$0xff]   ;;  %p413_p5 = pnand %p412_p4, %p406_p1 }
   0xd   :  { %350 = vmatpush3.bf16.msra.mxu0 %v387_v6  ;;  %v400_v21 = vld [vmem:[%s472_s24 + $0x38] sm:$0xff]  }
   0xe   :  { %351 = vmatprep.subr.bf16.mxu0 %v388_v7 }
   0xf   :  { %375 = vmatpush3.bf16.msra.mxu1 %v403_v15 }
  0x11   :  { %352 = vmatpush3.bf16.msra.mxu0 %v389_v8 }
  0x12   :  { %353 = vmatprep.subr.bf16.mxu0 %v390_v9  ;;  %377 = vmatmul.mubr.msk.bf16.vlgmr.msra.gmra.mrb[0].mxu1 %vm215_vm1, %v404_v17 }
  0x15   :  { %354 = vmatpush3.bf16.msra.mxu0 %v391_v10 }
  0x16   :  { %355 = vmatprep.subr.bf16.mxu0 %v392_v11 }
  0x19   :  { %356 = vmatpush3.bf16.msra.mxu0 %v393_v13 }
  0x1a   :  { %357 = vmatprep.subr.bf16.mxu0 %v394_v14 }
  0x1d   :  { %358 = vmatpush3.bf16.msra.mxu0 %v395_v16 }
  0x1e   :  { %359 = vmatprep.subr.bf16.mxu0 %v396_v18 }
  0x21   :  { %360 = vmatpush3.bf16.msra.mxu0 %v397_v19 }
  0x22   :  { %361 = vmatprep.subr.bf16.mxu0 %v399_v20 }
  0x25   :  { %362 = vmatpush3.bf16.msra.mxu0 %v400_v21 }
  0x28   :  { %252 = vmatmul.mubr.bf16.vlgmr.msra.gmra.mrb[0].mxu0 %v325_v22 }
  0xe5   :  { %v293_v23 = vpop.f32.mrb[0].mxu1 }
  0xe6   :  { %v378_v24 = vpop.f32.mrb[1].mxu1 }
  0xe7   :  { %v296_v25 = vpop.f32.mrb[2].mxu1 }
  0xe8   :  { %v379_v26 = vpop.f32.mrb[3].mxu1 }
  0xfb   :  { %v363_v27 = vpop.f32.mrb[0].mxu0 }
  0xfc   :  { %v364_v28 = vpop.f32.mrb[1].mxu0 }
  0xfd   :  { %v365_v30 = vadd.f32 %v364_v28, %v363_v27  ;;  %v366_v31 = vpop.f32.mrb[2].mxu0 }
  0xfe   :  { %v367_v32 = vpop.f32.mrb[3].mxu0 }
  0xff   :  { %v254_v33 = vadd.f32 %v365_v30, %v324_v29 }
 0x101   :  { %v294_v34 = vadd.f32 %v293_v23, %v254_v33 }
 0x103   :  { %299 = vst [vmem:[#allocation4] sm:$0xff] %v294_v34 }
 0x104   :  { %416 = shalt.err (!%p413_p5)
}
 0x105   :  { %s417_s5 = scalar_lea.hbm %s515_s4, 128 }
 0x106   :  { %p418_p6 = scmp.ne.s32.totalorder %s515_s4, %s417_s5  ;;  %p421_p7 = scmp.lt.u32.totalorder %s417_s5, %s515_s4 }
 0x108   :  { %p423_p8 = pnand %p421_p7, %p418_p6 }
 0x10a   :  { %426 = shalt.err (!%p423_p8)
}
 0x10b   :  { %309 = dma.vmem_to_hbm [thread:$0]  %s307_s29, 128, %s515_s4, [#allocation5]  }
 0x10c   :  { %427 = dma.done.wait [#allocation5], 128  }
 0x10d   :  { %428 = vsyncadd [#allocation5], 4294967168 }
 0x10e   :  { %313 = vsyncpa [#allocation5], 1 }

</bundles_post_ra>
